<compile_context>
chip_gen: v6e
topology: v6e:2x2x1
jax: 0.10.0
libtpu: 0.0.40
codegen_flags: <defaults>
</compile_context>

<pallas_src>
import math

import jax
import jax.numpy as jnp
from jax.experimental import pallas as pl
from jax.experimental.pallas import tpu as pltpu

_SHIFT = math.log(2.0)

_LANES = 512                        # lane-dense trailing dim (multiple of 128)
_TARGET_BLOCK_BYTES = 2 * 1024 * 1024   # ~2 MiB per input block
_MIN_STEPS = 4                      # aim for >= 4 grid steps (pipelining + 2 TCs on v7x)
_VMEM_LIMIT_BYTES = 32 * 1024 * 1024    # explicit, safe on v5e/v6e/v7x


def _shifted_softplus_kernel(x_ref, o_ref):
    # Compute in f32 regardless of I/O dtype (v5e has no bf16 VPU/EUP paths;
    # this also matches a torch f32 reference for narrow-dtype inputs).
    x = x_ref[...].astype(jnp.float32)
    # Numerically stable softplus: max(x, 0) + log1p(exp(-|x|)).
    sp = jnp.maximum(x, 0.0) + jnp.log1p(jnp.exp(-jnp.abs(x)))
    o_ref[...] = (sp - _SHIFT).astype(o_ref.dtype)


def _reference(x):
    """Plain-XLA fallback / reference: softplus(x) - log(2), f32 internal."""
    x32 = x.astype(jnp.float32)
    return (jax.nn.softplus(x32) - _SHIFT).astype(x.dtype)


def shifted_softplus(x, *, min_pallas_bytes=256 * 1024):
    """Applies softplus(x) - log(2) elementwise via a Pallas TPU kernel."""
    orig_shape = x.shape
    orig_dtype = x.dtype
    total = x.size
    itemsize = jnp.dtype(orig_dtype).itemsize

    # Tiny inputs: pallas_call overhead + lost fusion dwarf any kernel gain.
    if total == 0 or total * itemsize < min_pallas_bytes:
        return _reference(x)

    # Flatten to 1-D, pad to a multiple of the lane width, reshape lane-dense.
    flat = x.reshape(-1)
    rows = -(-total // _LANES)          # ceil
    padded = rows * _LANES
    if padded != total:
        flat = jnp.pad(flat, (0, padded - total))   # softplus(0)-log2 = 0; sliced off anyway
    x2 = flat.reshape(rows, _LANES)

    # Row-tile from a byte budget (multiple of 8 sublanes).
    tm_budget = max(8, (_TARGET_BLOCK_BYTES // (_LANES * itemsize)) // 8 * 8)
    if rows >= 16:
        # Cap the tile so there are >= _MIN_STEPS grid steps when possible.
        tm_steps = -(-rows // _MIN_STEPS)
        tm_steps = max(8, ((tm_steps + 7) // 8) * 8)
        tm = min(tm_budget, tm_steps, rows)
    else:
        tm = rows                       # full-dim exception to the (8,128) rule

    grid = (-(-rows // tm),)

    out = pl.pallas_call(
        _shifted_softplus_kernel,
        out_shape=jax.ShapeDtypeStruct((rows, _LANES), orig_dtype),
        grid_spec=pl.GridSpec(
            grid=grid,
            in_specs=[pl.BlockSpec((tm, _LANES), lambda i: (i, 0))],
            out_specs=pl.BlockSpec((tm, _LANES), lambda i: (i, 0)),
        ),
        input_output_aliases={0: 0},    # donate the padded input slab
        compiler_params=pltpu.CompilerParams(
            dimension_semantics=("parallel",),
            vmem_limit_bytes=_VMEM_LIMIT_BYTES,
        ),
    )(x2)

    out_flat = out.reshape(-1)
    if padded != total:
        out_flat = out_flat[:total]
    return out_flat.reshape(orig_shape)


if __name__ == "__main__":
    key = jax.random.PRNGKey(0)
    k1, k2, k3 = jax.random.split(key, 3)

    # 1) SchNet-like activation, big enough (~1.5 MiB) to take the Pallas path.
    x1 = jax.random.normal(k1, (2048, 192), dtype=jnp.float32) * 5.0
    y1 = jax.block_until_ready(shifted_softplus(x1))
    assert y1.shape == x1.shape and y1.dtype == x1.dtype
    assert jnp.max(jnp.abs(y1 - _reference(x1))) < 1e-5

    # 2) Tiny input (32 KiB) -> plain-XLA fallback path.
    x2 = jax.random.normal(k2, (64, 128), dtype=jnp.float32) * 5.0
    y2 = jax.block_until_ready(shifted_softplus(x2))
    assert y2.shape == x2.shape and y2.dtype == x2.dtype
    assert jnp.max(jnp.abs(y2 - _reference(x2))) < 1e-5

    # 3) Ragged shape + bf16, forced through the Pallas path
    #    (exercises lane padding, partial last tile, f32 internal compute).
    x3 = (jax.random.normal(k3, (1000, 100), dtype=jnp.float32) * 5.0).astype(jnp.bfloat16)
    y3 = jax.block_until_ready(shifted_softplus(x3, min_pallas_bytes=0))
    assert y3.shape == x3.shape and y3.dtype == x3.dtype
    err = jnp.max(jnp.abs(y3.astype(jnp.float32) - _reference(x3).astype(jnp.float32)))
    assert err < 0.25  # 1 bf16 ulp at the largest outputs

    print("KERNEL_OK")
</pallas_src>

<mosaic_0001>
module attributes {stable_mosaic.version = 11 : i64} {
  func.func @_shifted_softplus_kernel(%arg0: i32, %arg1: memref<192x512xf32, #tpu.memory_space<vmem>>, %arg2: memref<192x512xf32, #tpu.memory_space<vmem>>) attributes {dimension_semantics = [#tpu.dimension_semantics<parallel>], iteration_bounds = array<i64: 4>, scalar_prefetch = 0 : i64, scratch_operands = 0 : i64, tpu.core_type = #tpu.core_type<tc>, window_params = [{transform_indices = @transform_0, window_bounds = array<i64: 192, 512>}, {transform_indices = @transform_1, window_bounds = array<i64: 192, 512>}]} {
    %c0 = arith.constant 0 : index
    %c0_0 = arith.constant 0 : index
    %0 = vector.load %arg1[%c0, %c0_0] : memref<192x512xf32, #tpu.memory_space<vmem>>, vector<192x512xf32>
    %cst = arith.constant 0.000000e+00 : f32
    %1 = vector.broadcast %cst : f32 to vector<192x512xf32>
    %2 = arith.maximumf %0, %1 : vector<192x512xf32>
    %3 = math.absf %0 : vector<192x512xf32>
    %cst_1 = arith.constant 0.000000e+00 : f32
    %4 = vector.broadcast %cst_1 : f32 to vector<192x512xf32>
    %5 = arith.subf %4, %3 : vector<192x512xf32>
    %6 = math.exp %5 : vector<192x512xf32>
    %7 = math.log1p %6 : vector<192x512xf32>
    %8 = arith.addf %2, %7 : vector<192x512xf32>
    %cst_2 = arith.constant 0.693147182 : f32
    %9 = vector.broadcast %cst_2 : f32 to vector<192x512xf32>
    %10 = arith.subf %8, %9 : vector<192x512xf32>
    %c0_3 = arith.constant 0 : index
    %c0_4 = arith.constant 0 : index
    %11 = vector.load %arg2[%c0_3, %c0_4] : memref<192x512xf32, #tpu.memory_space<vmem>>, vector<192x512xf32>
    tpu.vector_store %arg2[%c0_3, %c0_4], %10 {strides = array<i32>} : memref<192x512xf32, #tpu.memory_space<vmem>>, vector<192x512xf32>,
    return
  }
  func.func @transform_0(%arg0: i32) -> (i32, i32) {
    %c0_i32 = arith.constant 0 : i32
    %c0_i32_0 = arith.constant 0 : i32
    return %arg0, %c0_i32 : i32, i32
  }
  func.func @transform_1(%arg0: i32) -> (i32, i32) {
    %c0_i32 = arith.constant 0 : i32
    %c0_i32_0 = arith.constant 0 : i32
    return %arg0, %c0_i32 : i32, i32
  }
}

</mosaic_0001>

<bundles_post_ra>
// kernel: tpu_custom_call.1
= control target key start
LH: loop header
LB: loop body
LE: loop exit
PB: predicated region body
PF: predicated region fallthrough
CT: control target
= control target key end

     0   :  { %6 = vsyncpa [#allocation3], 0  ;;  %s4412_s0 = inlined_call_operand.hbm [shape: f32[768,512], index: 0, kind: input, shape index: {}, may-alias: {0,1}]   ;;  %s4413_s1 = inlined_call_operand.hbm [shape: f32[768,512], index: 1, kind: output, shape index: {}, may-alias: {0,1}]  }
   0x1   :  { %8 = vsyncpa [#allocation3 + $0x1], 0 }
   0x2   :  { %9 = vsyncpa [#allocation4], 0 }
   0x3   :  { %11 = vsyncpa [#allocation4 + $0x1], 0  ;;  %s2612_s6 = smov 0   ;;  %s2614_s7 = smov 0  }
   0x4   :  { %s2616_s8 = smov 0   ;;  %s2618_s9 = smov 0  }
   0x5 LB: > { %s2633_s10 = sadd.s32 4294967295, %s2594_s9   ;;  %s1954_s11 = sadd.s32 4294967294, %s2594_s9   ;;  %s2594_s9 = sphi %s2618_s9, %s4611_s9   ;;  %s2590_s8 = sphi %s2616_s8, %s4610_s8   ;;  %s2586_s7 = sphi %s2614_s7, %s4609_s7   ;;  %s2582_s6 = sphi %s2612_s6, %s4608_s6  }
   0x6   : > { %s2637_s12 = sadd.s32 1, %s2594_s9   ;;  %s24_s13 = sadd.s32 1, %s2590_s8 }
   0x7   : > { %s21_s14 = ssub.s32 %s2594_s9, %s2637_s12  ;;  %p31_p0 = scmp.ne.s32.totalorder %s2590_s8, %s2586_s7 }
   0x8   : > { %p22_p1 = scmp.eq.s32.totalorder %s21_s14, 0  ;;  %p32_p2 = scmp.eq.s32.totalorder %s2594_s9, 0 }
   0x9   : > { %p37_p3 = scmp.ne.s32.totalorder %s2586_s7, %s2582_s6  ;;  %p38_p4 = scmp.eq.s32.totalorder %s2633_s10, 0 }
   0xa   : > { %s2649_s15 = scalar_select %p22_p1, %s2590_s8, %s24_s13  }
   0xb   : > { %p33_p5 = por %p32_p2, %p31_p0  ;;  %p2651_p6 = por %p38_p4, %p37_p3 }
   0xc   : > { %p61_p7 = scmp.eq.s32.totalorder %s2633_s10, 3  ;;  %p67_p8 = scmp.eq.s32.totalorder %s1954_s11, 3 }
   0xd   : > { %s4416_s16 = scalar_select %p2651_p6, 1, 0 }
   0xe   : > { %p2080_p9 = scmp.lt.s32.totalorder %s2594_s9, 4  ;;  %p2657_p10 = por %p61_p7, %p31_p0 }
   0xf   : > { %p2661_p11 = por %p67_p8, %p37_p3  ;;  %s87_s19 = sand.u32 1, %s2590_s8  }
  0x10   : > { %s4417_s17 = scalar_select %p2657_p10, 1, 0 }
  0x11   : > { %s4418_s18 = scalar_select %p2661_p11, 1, 0 }
  0x12   : > { %s2064_s20 = smul.u32 12288, %s2594_s9  ;;  %p2672_p12 = pnand %p2080_p9, %p33_p5 }
  0x13   : > { %s2066_s21 = smul.u32 768, %s87_s19  ;;  %s2678_s28 = scalar_lea.sflag [#allocation3], %s87_s19 }
  0x14   : > { %s2670_s24 = scalar_lea.hbm %s4412_s0, %s2064_s20  ;;  %p2504_p0 = pneg %p2672_p12 }
  0x15   : > { %s91_s26 = scalar_lea.vmem [#allocation2], %s2066_s21  ;;  %s2502_s29 = scalar_lea.hbm %s2670_s24, 12288 }
  0x16   : > { %s99_s27 = sshll.u32 %s91_s26, 4  ;;  %p2503_p13 = scmp.ne.s32.totalorder %s2670_s24, %s2502_s29  ;;  %s2676_s27 = int_to_ptr.vmem [resolvable:$true] %s99_s27 }
  0x17   : > { %s2507_s3 = scalar_lea.hbm %s4412_s0, 49152  ;;  %p2508_p3 = scmp.lt.s32.totalorder %s2670_s24, %s4412_s0 }
  0x18   : > { %p2505_p1 = pnand %p2504_p0, %p2503_p13  ;;  %p2509_p4 = scmp.lt.s32.totalorder %s2507_s3, %s2502_s29 }
  0x1a   : > { %p2506_p2 = pneg %p2505_p1  ;;  %p2510_p5 = por %p2509_p4, %p2508_p3 }
  0x1c   : > { %p2511_p7 = pnand %p2510_p5, %p2506_p2 }
  0x1e   : > { %2514 = shalt.err (!%p2511_p7)
}
  0x1f   : > { %s2515_s11 = scalar_lea.vmem %s2676_s27, 12288  ;;  %s2596_s13 = smov [#allocation2]  }
  0x20   : > { %p2516_p8 = scmp.ne.s32.totalorder %s2676_s27, %s2515_s11  ;;  %s2520_s14 = sshll.u32 %s2596_s13, 4  ;;  %s2521_s14 = int_to_ptr.vmem [resolvable:$false] %s2520_s14 }
  0x21   : > { %s2522_s19 = scalar_lea.vmem %s2521_s14, 24576  ;;  %p2523_p1 = scmp.lt.s32.totalorder %s2676_s27, %s2521_s14 }
  0x22   : > { %p2518_p9 = pnand %p2516_p8, %p2504_p0  ;;  %p2524_p11 = scmp.lt.s32.totalorder %s2522_s19, %s2515_s11 }
  0x24   : > { %p2519_p13 = pneg %p2518_p9  ;;  %p2525_p10 = por %p2524_p11, %p2523_p1 }
  0x26   : > { %p2526_p6 = pnand %p2525_p10, %p2519_p13 }
  0x28   : > { %2529 = shalt.err (!%p2526_p6)
}
  0x29   : > { %s2597_s20 = smov 512   ;;  %s2598_s21 = smov 32  }
  0x2a   : > { %2075 = dma.hbm_to_vmem [thread:$0]  (!%p2672_p12), %s2670_s24, 12288, %s2676_s27, %s2678_s28, %s2597_s20, %s2597_s20, %s2598_s21  }
  0x2b   : > { %p1959_p0 = scmp.ge.s32.totalorder %s2594_s9, 1  ;;  %p107_p2 = scmp.lt.s32.totalorder %s2594_s9, 5 }
  0x2d   : > { %p108_p3 = pnand %p1959_p0, %p107_p2 }
  0x2e   : > { %s2702_s22 = sand.u32 (!%p108_p3), 1, %s2586_s7   ;;  %p4420_p6 = scmp.ne.s32.totalorder (!%p108_p3), %s4416_s16, 0 }
  0x2f   : > { %111 = sbr.rel (%p108_p3) target bundleno = 479 (0x1df), region = 24  ;;  %s114_s26 = scalar_lea.sflag (!%p108_p3), [#allocation3], %s2702_s22 }
  0x30   : > { %s2067_s23 = smul.u32 (!%p108_p3), 768, %s2702_s22 }
  0x32   : > { %s2708_s29 = scalar_lea.vmem (!%p108_p3), [#allocation2], %s2067_s23 }
  0x34   : > { %2573 = dma.done.wait (%p4420_p6), %s114_s26, 12288  }
  0x35   : > { %2575 = vsyncadd (%p4420_p6), %s114_s26, 4294955008  ;;  %v2715_v0 = vld [vmem:[%s2708_s29] sm:$0xff]  ;;  %v2718_v1 = vld [vmem:[%s2708_s29 + $0x8] sm:$0xff]  ;;  %s2873_s16 = scalar_lea.vmem [#allocation5], %s2067_s23  ;;  %s2065_s24 = smul.u32 12288, %s2633_s10 }
  0x36   : > { %v2721_v2 = vld [vmem:[%s2708_s29 + $0x10] sm:$0xff]  ;;  %v330_v3 = vand.u32 2147483647, %v2715_v0  ;;  %v331_v4 = vand.u32 2147483647, %v2718_v1  ;;  %v2727_v6 = vld [vmem:[%s2708_s29 + $0x18] sm:$0xff] }
  0x37   : > { %v332_v5 = vand.u32 2147483647, %v2721_v2  ;;  %v2730_v7 = vld [vmem:[%s2708_s29 + $0x20] sm:$0xff]  ;;  %v333_v10 = vand.u32 2147483647, %v2727_v6  ;;  %v2734_v11 = vld [vmem:[%s2708_s29 + $0x28] sm:$0xff]  ;;  %s4367_s30 = scalar_lea.hbm %s4413_s1, %s2065_s24 }
  0x38   : > { %v426_v8 = vsub.f32 0.0, %v330_v3  ;;  %v427_v9 = vsub.f32 0.0, %v331_v4  ;;  %v334_v13 = vand.u32 2147483647, %v2730_v7  ;;  %v2738_v14 = vld [vmem:[%s2708_s29 + $0x30] sm:$0xff]  ;;  %v2741_v15 = vld [vmem:[%s2708_s29 + $0x38] sm:$0xff] }
  0x39   : > { %v428_v12 = vsub.f32 0.0, %v332_v5  ;;  %v429_v18 = vsub.f32 0.0, %v333_v10  ;;  %v335_v21 = vand.u32 2147483647, %v2734_v11  ;;  %v336_v23 = vand.u32 2147483647, %v2738_v14 }
  0x3a   : > { %v522_v16 = vmul.f32 1.442695, %v426_v8  ;;  %v524_v17 = vmul.f32 1.442695, %v427_v9  ;;  %v430_v20 = vsub.f32 0.0, %v334_v13  ;;  %v2747_v27 = vld [vmem:[%s2708_s29 + $0x40] sm:$0xff] }
  0x3b   : > { %v526_v19 = vmul.f32 1.442695, %v428_v12  ;;  %v528_v22 = vmul.f32 1.442695, %v429_v18  ;;  %v337_v24 = vand.u32 2147483647, %v2741_v15 }
  0x3c   : > { %2118 = vpow2.f32 %v522_v16  ;;  %v530_v25 = vmul.f32 1.442695, %v430_v20  ;;  %v431_v26 = vsub.f32 0.0, %v335_v21  ;;  %v2750_v28 = vld [vmem:[%s2708_s29 + $0x48] sm:$0xff]  ;;  %v432_v29 = vsub.f32 0.0, %v336_v23  ;;  %v2753_v31 = vld [vmem:[%s2708_s29 + $0x50] sm:$0xff] }
  0x3d   : > { %2120 = vpow2.f32 %v524_v17  ;;  %v433_v30 = vsub.f32 0.0, %v337_v24  ;;  %v338_v33 = vand.u32 2147483647, %v2747_v27  ;;  %v2757_v34 = vld [vmem:[%s2708_s29 + $0x58] sm:$0xff]  ;;  %v339_v36 = vand.u32 2147483647, %v2750_v28 }
  0x3e   : > { %2122 = vpow2.f32 %v526_v19  ;;  %v532_v32 = vmul.f32 1.442695, %v431_v26  ;;  %v534_v35 = vmul.f32 1.442695, %v432_v29  ;;  %v340_v39 = vand.u32 2147483647, %v2753_v31 }
  0x3f   : > { %2124 = vpow2.f32 %v528_v22  ;;  %v536_v37 = vmul.f32 1.442695, %v433_v30  ;;  %v434_v38 = vsub.f32 0.0, %v338_v33  ;;  %v2762_v40 = vld [vmem:[%s2708_s29 + $0x60] sm:$0xff]  ;;  %v435_v41 = vsub.f32 0.0, %v339_v36  ;;  %v2766_v43 = vld [vmem:[%s2708_s29 + $0x68] sm:$0xff] }
  0x40   : > { %2126 = vpow2.f32 %v530_v25  ;;  %v341_v42 = vand.u32 2147483647, %v2757_v34  ;;  %v234_v44 = vmax.f32 %v2715_v0, 0.0  ;;  %v436_v46 = vsub.f32 0.0, %v340_v39  ;;  %v2774_v54 = vld [vmem:[%s2708_s29 + $0x70] sm:$0xff]  ;;  %v2782_v62 = vld [vmem:[%s2708_s29 + $0x78] sm:$0xff] }
  0x41   : > { %2128 = vpow2.f32 %v532_v32  ;;  %v538_v45 = vmul.f32 1.442695, %v434_v38  ;;  %v235_v47 = vmax.f32 %v2718_v1, 0.0  ;;  %v540_v48 = vmul.f32 1.442695, %v435_v41  ;;  %s1881_s25 = sshll.u32 %s2873_s16, 4  ;;  %s4369_s25 = int_to_ptr.vmem [resolvable:$true] %s1881_s25 }
  0x42   : > { %2130 = vpow2.f32 %v534_v35  ;;  %v437_v49 = vsub.f32 0.0, %v341_v42  ;;  %v342_v50 = vand.u32 2147483647, %v2762_v40  ;;  %v236_v51 = vmax.f32 %v2721_v2, 0.0  ;;  %v2795_v35 = vld [vmem:[%s2708_s29 + $0x80] sm:$0xff]  ;;  %s1867_s2 = scalar_lea.sflag [#allocation4], %s2702_s22 }
  0x43   : > { %2132 = vpow2.f32 %v536_v37  ;;  %v542_v52 = vmul.f32 1.442695, %v436_v46  ;;  %v343_v53 = vand.u32 2147483647, %v2766_v43  ;;  %v237_v55 = vmax.f32 %v2727_v6, 0.0  ;;  %s2530_s3 = scalar_lea.vmem %s4369_s25, 12288 }
  0x44   : > { %v238_v56 = vmax.f32 %v2730_v7, 0.0  ;;  %v239_v57 = vmax.f32 %v2734_v11, 0.0  ;;  %v544_v58 = vmul.f32 1.442695, %v437_v49  ;;  %2134 = vpow2.f32 %v538_v45  ;;  %p2531_p10 = scmp.ne.s32.totalorder %s4369_s25, %s2530_s3  ;;  %p4606_p11 = scmp.ne.s32.totalorder %s4417_s17, 0 }
  0x45   : > { %v438_v61 = vsub.f32 0.0, %v342_v50  ;;  %2136 = vpow2.f32 %v540_v48  ;;  %v344_v4 = vand.u32 2147483647, %v2774_v54  ;;  %v439_v10 = vsub.f32 0.0, %v343_v53  ;;  %s2599_s10 = smov [#allocation5]  }
  0x46   : > { %2138 = vpow2.f32 %v542_v52  ;;  %v345_v17 = vand.u32 2147483647, %v2782_v62  ;;  %p2532_p12 = pnand %p2531_p10, %p4606_p11  ;;  %s2534_s4 = sshll.u32 %s2599_s10, 4  ;;  %s2535_s4 = int_to_ptr.vmem [resolvable:$false] %s2534_s4 }
  0x47   : > { %2140 = vpow2.f32 %v544_v58  ;;  %v546_v22 = vmul.f32 1.442695, %v438_v61  ;;  %v2792_v26 = vsub.f32 0.0, %v344_v4  ;;  %v548_v33 = vmul.f32 1.442695, %v439_v10  ;;  %s2536_s5 = scalar_lea.vmem %s2535_s4, 24576  ;;  %p2537_p5 = scmp.lt.s32.totalorder %s4369_s25, %s2535_s4 }
  0x48   : > { %v2797_v38 = vsub.f32 0.0, %v345_v17  ;;  %p2533_p4 = pneg %p2532_p12  ;;  %p2538_p7 = scmp.lt.s32.totalorder %s2536_s5, %s2530_s3 }
  0x49   : > { %v2119_v5 = vpop.eup %2118 }
  0x4a   : > { %v2121_v12 = vpop.eup %2120  ;;  %v714_v13 = vadd.f32 1.0, %v2119_v5  ;;  %v717_v19 = vmul.f32 -0.5, %v2119_v5  ;;  %v720_v30 = vand.u32 2147483647, %v2119_v5  ;;  %p2539_p8 = por %p2538_p7, %p2537_p5 }
  0x4b   : > { %v2123_v18 = vpop.eup %2122  ;;  %v723_v20 = vadd.f32 1.0, %v2121_v12  ;;  %v726_v21 = vmul.f32 -0.5, %v2121_v12  ;;  %v729_v36 = vand.u32 2147483647, %v2121_v12 }
  0x4c   : > { %v2125_v23 = vpop.eup %2124  ;;  %2142 = vlog2.f32 %v714_v13  ;;  %v732_v24 = vadd.f32 1.0, %v2123_v18  ;;  %v735_v32 = vmul.f32 -0.5, %v2123_v18  ;;  %v718_v41 = vadd.f32 1.0, %v717_v19  ;;  %p2540_p9 = pnand %p2539_p8, %p2533_p4 }
  0x4d   : > { %v2127_v29 = vpop.eup %2126  ;;  %2144 = vlog2.f32 %v723_v20  ;;  %v741_v37 = vadd.f32 1.0, %v2125_v23  ;;  %v727_v42 = vadd.f32 1.0, %v726_v21  ;;  %v738_v45 = vand.u32 2147483647, %v2123_v18 }
  0x4e   : > { %2146 = vlog2.f32 %v732_v24  ;;  %v2129_v39 = vpop.eup %2128  ;;  %v744_v48 = vmul.f32 -0.5, %v2125_v23  ;;  %v750_v49 = vadd.f32 1.0, %v2127_v29  ;;  %vm2800_vm0 = vcmp.lt.f32.partialorder %v720_v30, 0.0004427343 }
  0x4f   : > { %2148 = vpow2.f32 %v546_v22  ;;  %v2131_v46 = vpop.eup %2130  ;;  %v736_v53 = vadd.f32 1.0, %v735_v32  ;;  %v753_v58 = vmul.f32 -0.5, %v2127_v29  ;;  %vm2804_vm1 = vcmp.lt.f32.partialorder %v729_v36, 0.0004427343 }
  0x50   : > { %2150 = vlog2.f32 %v741_v37  ;;  %v2133_v61 = vpop.eup %2132  ;;  %v747_v10 = vand.u32 2147483647, %v2125_v23  ;;  %v759_v13 = vadd.f32 1.0, %v2129_v39  ;;  %v762_v17 = vmul.f32 -0.5, %v2129_v39 }
  0x51   : > { %2152 = vpow2.f32 %v548_v33  ;;  %v719_v19 = vmul.f32 %v2119_v5, %v718_v41  ;;  %v728_v20 = vmul.f32 %v2121_v12, %v727_v42  ;;  %vm2808_vm2 = vcmp.lt.f32.partialorder %v738_v45, 0.0004427343  ;;  %v2812_v24 = vpop.eup %2134 }
  0x52   : > { %2154 = vlog2.f32 %v750_v49  ;;  %v768_v22 = vadd.f32 1.0, %v2131_v46  ;;  %v745_v30 = vadd.f32 1.0, %v744_v48  ;;  %v756_v32 = vand.u32 2147483647, %v2127_v29  ;;  %v2814_v36 = vpop.eup %2136 }
  0x53   : > { %2156 = vlog2.f32 %v759_v13  ;;  %v771_v33 = vmul.f32 -0.5, %v2131_v46  ;;  %v737_v37 = vmul.f32 %v2123_v18, %v736_v53  ;;  %v754_v25 = vadd.f32 1.0, %v753_v58  ;;  %v2816_v16 = vpop.eup %2138 }
  0x54   : > { %2158 = vlog2.f32 %v768_v22  ;;  %v777_v49 = vadd.f32 1.0, %v2133_v61  ;;  %vm2818_vm3 = vcmp.lt.f32.partialorder %v747_v10, 0.0004427343  ;;  %v763_v12 = vadd.f32 1.0, %v762_v17  ;;  %v2822_v45 = vpop.eup %2140 }
  0x55   : > { %v765_v41 = vand.u32 2147483647, %v2129_v39  ;;  %v780_v42 = vmul.f32 -0.5, %v2133_v61  ;;  %v772_v48 = vadd.f32 1.0, %v771_v33  ;;  %v774_v13 = vand.u32 2147483647, %v2131_v46 }
  0x56   : > { %2160 = vlog2.f32 %v777_v49  ;;  %v786_v9 = vadd.f32 1.0, %v2812_v24  ;;  %v746_v18 = vmul.f32 %v2125_v23, %v745_v30  ;;  %vm2825_vm4 = vcmp.lt.f32.partialorder %v756_v32, 0.0004427343 }
  0x57   : > { %v783_v58 = vand.u32 2147483647, %v2133_v61  ;;  %v789_v10 = vmul.f32 -0.5, %v2812_v24  ;;  %v755_v8 = vmul.f32 %v2127_v29, %v754_v25  ;;  %v781_v17 = vadd.f32 1.0, %v780_v42 }
  0x58   : > { %2162 = vlog2.f32 %v786_v9  ;;  %v795_v50 = vadd.f32 1.0, %v2814_v36  ;;  %v764_v63 = vmul.f32 %v2129_v39, %v763_v12  ;;  %vm2831_vm5 = vcmp.lt.f32.partialorder %v765_v41, 0.0004427343 }
  0x59   : > { %v2143_v22 = vpop.eup %2142  ;;  %v792_v23 = vand.u32 2147483647, %v2812_v24  ;;  %v773_v60 = vmul.f32 %v2131_v46, %v772_v48  ;;  %vm2836_vm6 = vcmp.lt.f32.partialorder %v774_v13, 0.0004427343  ;;  %vm2844_vm7 = vcmp.lt.f32.partialorder %v783_v58, 0.0004427343 }
  0x5a   : > { %v2145_v3 = vpop.eup %2144  ;;  %v716_v33 = vmul.f32 0.6931472, %v2143_v22  ;;  %2164 = vlog2.f32 %v795_v50  ;;  %v790_v12 = vadd.f32 1.0, %v789_v10  ;;  %v804_v41 = vadd.f32 1.0, %v2816_v16 }
  0x5b   : > { %v2147_v30 = vpop.eup %2146  ;;  %v725_v32 = vmul.f32 0.6931472, %v2145_v3  ;;  %v782_v42 = vmul.f32 %v2133_v61, %v781_v17  ;;  %v798_v48 = vmul.f32 -0.5, %v2814_v36  ;;  %vm2860_vm8 = vcmp.lt.f32.partialorder %v792_v23, 0.0004427343 }
  0x5c   : > { %v2840_v9 = vpop.eup %2148  ;;  %v722_v25 = vsel %vm2800_vm0, %v719_v19, %v716_v33  ;;  %v734_v29 = vmul.f32 0.6931472, %v2147_v30  ;;  %2166 = vlog2.f32 %v804_v41  ;;  %v801_v4 = vand.u32 2147483647, %v2814_v36 }
  0x5d   : > { %v2151_v3 = vpop.eup %2150  ;;  %v1578_v46 = vadd.f32 %v722_v25, %v234_v44  ;;  %v731_v50 = vsel %vm2804_vm1, %v728_v20, %v725_v32  ;;  %v807_v1 = vmul.f32 -0.5, %v2816_v16  ;;  %v791_v17 = vmul.f32 %v2812_v24, %v790_v12 }
  0x5e   : > { %v2854_v52 = vpop.eup %2152  ;;  %v1579_v19 = vadd.f32 %v731_v50, %v235_v47  ;;  %v740_v13 = vsel %vm2808_vm2, %v737_v37, %v734_v29  ;;  %v743_v58 = vmul.f32 0.6931472, %v2151_v3  ;;  %v813_v37 = vadd.f32 1.0, %v2822_v45 }
  0x5f   : > { %v2155_v0 = vpop.eup %2154  ;;  %v1960_v44 = vadd.f32 -0.6931472, %v1578_v46  ;;  %v1580_v61 = vadd.f32 %v740_v13, %v236_v51  ;;  %v799_v33 = vadd.f32 1.0, %v798_v48  ;;  %v816_v30 = vmul.f32 -0.5, %v2822_v45 }
  0x60   : > { %v1961_v20 = vadd.f32 -0.6931472, %v1579_v19  ;;  %v749_v47 = vsel %vm2818_vm3, %v746_v18, %v743_v58  ;;  %v752_v21 = vmul.f32 0.6931472, %v2155_v0  ;;  %v2157_v22 = vpop.eup %2156  ;;  %2168 = vlog2.f32 %v813_v37 }
  0x61   : > { %1770 = vst [vmem:[%s2873_s16] sm:$0xff] %v1960_v44  ;;  %v1962_v2 = vadd.f32 -0.6931472, %v1580_v61  ;;  %v1581_v51 = vadd.f32 %v749_v47, %v237_v55  ;;  %v2159_v5 = vpop.eup %2158  ;;  %v761_v23 = vmul.f32 0.6931472, %v2157_v22  ;;  %vm2886_vm9 = vcmp.lt.f32.partialorder %v801_v4, 0.0004427343 }
  0x62   : > { %1771 = vst [vmem:[%s2873_s16 + $0x8] sm:$0xff] %v1961_v20  ;;  %v758_v18 = vsel %vm2825_vm4, %v755_v8, %v752_v21  ;;  %v770_v6 = vmul.f32 0.6931472, %v2159_v5  ;;  %v808_v8 = vadd.f32 1.0, %v807_v1  ;;  %v810_v29 = vand.u32 2147483647, %v2816_v16 }
  0x63   : > { %1772 = vst [vmem:[%s2873_s16 + $0x10] sm:$0xff] %v1962_v2  ;;  %v1963_v32 = vadd.f32 -0.6931472, %v1581_v51  ;;  %v1582_v25 = vadd.f32 %v758_v18, %v238_v56  ;;  %v2161_v24 = vpop.eup %2160  ;;  %v767_v53 = vsel %vm2831_vm5, %v764_v63, %v761_v23  ;;  %v822_v12 = vadd.f32 1.0, %v2840_v9  ;;  %v2923_v20 = vld [vmem:[%s2708_s29 + $0x88] sm:$0xff]  ;;  %v2930_v2 = vld [vmem:[%s2708_s29 + $0x90] sm:$0xff] }
  0x64   : > { %v1583_v7 = vadd.f32 %v767_v53, %v239_v57  ;;  %v776_v56 = vsel %vm2836_vm6, %v773_v60, %v770_v6  ;;  %v779_v3 = vmul.f32 0.6931472, %v2161_v24  ;;  %v4441_v50 = vmax.f32 %v2738_v14, 0.0 }
  0x65   : > { %1773 = vst [vmem:[%s2873_s16 + $0x18] sm:$0xff] %v1963_v32  ;;  %v1964_v41 = vadd.f32 -0.6931472, %v1582_v25  ;;  %v2163_v46 = vpop.eup %2162  ;;  %v800_v63 = vmul.f32 %v2814_v36, %v799_v33  ;;  %v817_v48 = vadd.f32 1.0, %v816_v30  ;;  %2170 = vlog2.f32 %v822_v12  ;;  %v2944_v30 = vld [vmem:[%s2708_s29 + $0x98] sm:$0xff]  ;;  %v2951_v25 = vld [vmem:[%s2708_s29 + $0xa0] sm:$0xff] }
  0x66   : > { %v1584_v49 = vadd.f32 %v776_v56, %v4441_v50  ;;  %v1965_v19 = vadd.f32 -0.6931472, %v1583_v7  ;;  %v785_v11 = vsel %vm2844_vm7, %v782_v42, %v779_v3  ;;  %v788_v57 = vmul.f32 0.6931472, %v2163_v46  ;;  %v2964_v3 = vld [vmem:[%s2708_s29 + $0xa8] sm:$0xff] }
  0x67   : > { %1774 = vst [vmem:[%s2873_s16 + $0x20] sm:$0xff] %v1964_v41  ;;  %v825_v59 = vmul.f32 -0.5, %v2840_v9  ;;  %v2165_v60 = vpop.eup %2164  ;;  %v4442_v58 = vmax.f32 %v2741_v15, 0.0  ;;  %v809_v0 = vmul.f32 %v2816_v16, %v808_v8  ;;  %v831_v36 = vadd.f32 1.0, %v2854_v52 }
  0x68   : > { %v1966_v13 = vadd.f32 -0.6931472, %v1584_v49  ;;  %1775 = vst [vmem:[%s2873_s16 + $0x28] sm:$0xff] %v1965_v19  ;;  %v794_v44 = vsel %vm2860_vm8, %v791_v17, %v788_v57  ;;  %v797_v39 = vmul.f32 0.6931472, %v2165_v60  ;;  %v4445_v4 = vmax.f32 %v2747_v27, 0.0 }
  0x69   : > { %v1585_v14 = vadd.f32 %v785_v11, %v4442_v58  ;;  %vm2913_vm10 = vcmp.lt.f32.partialorder %v810_v29, 0.0004427343  ;;  %v819_v61 = vand.u32 2147483647, %v2822_v45  ;;  %v818_v1 = vmul.f32 %v2822_v45, %v817_v48  ;;  %v2167_v10 = vpop.eup %2166  ;;  %v2970_v11 = vld [vmem:[%s2708_s29 + $0xb0] sm:$0xff] }
  0x6a   : > { %1776 = vst [vmem:[%s2873_s16 + $0x30] sm:$0xff] %v1966_v13  ;;  %v1586_v16 = vadd.f32 %v794_v44, %v4445_v4  ;;  %2172 = vlog2.f32 %v831_v36  ;;  %v803_v47 = vsel %vm2886_vm9, %v800_v63, %v797_v39  ;;  %v826_v21 = vadd.f32 1.0, %v825_v59  ;;  %v2978_v44 = vld [vmem:[%s2708_s29 + $0xb8] sm:$0xff] }
  0x6b   : > { %v1967_v15 = vadd.f32 -0.6931472, %v1585_v14  ;;  %v828_v37 = vand.u32 2147483647, %v2840_v9  ;;  %v550_v22 = vmul.f32 1.442695, %v2792_v26 }
  0x6c   : > { %v1968_v27 = vadd.f32 -0.6931472, %v1586_v16  ;;  %v4446_v45 = vmax.f32 %v2750_v28, 0.0  ;;  %v806_v17 = vmul.f32 0.6931472, %v2167_v10  ;;  %v834_v18 = vmul.f32 -0.5, %v2854_v52 }
  0x6d   : > { %1777 = vst [vmem:[%s2873_s16 + $0x38] sm:$0xff] %v1967_v15  ;;  %v552_v33 = vmul.f32 1.442695, %v2797_v38  ;;  %vm2936_vm11 = vcmp.lt.f32.partialorder %v819_v61, 0.0004427343  ;;  %2174 = vpow2.f32 %v550_v22  ;;  %v2169_v6 = vpop.eup %2168  ;;  %v4450_v55 = vmax.f32 %v2753_v31, 0.0 }
  0x6e   : > { %v1587_v51 = vadd.f32 %v803_v47, %v4446_v45  ;;  %v4449_v26 = vand.u32 2147483647, %v2795_v35  ;;  %1778 = vst [vmem:[%s2873_s16 + $0x40] sm:$0xff] %v1968_v27  ;;  %v812_v32 = vsel %vm2913_vm10, %v809_v0, %v806_v17  ;;  %v347_v38 = vand.u32 2147483647, %v2923_v20 }
  0x6f   : > { %2176 = vpow2.f32 %v552_v33  ;;  %v1588_v24 = vadd.f32 %v812_v32, %v4450_v55  ;;  %vm2955_vm12 = vcmp.lt.f32.partialorder %v828_v37, 0.0004427343  ;;  %v348_v29 = vand.u32 2147483647, %v2930_v2  ;;  %v2995_v55 = vld [vmem:[%s2708_s29 + $0xc0] sm:$0xff] }
  0x70   : > { %v442_v23 = vsub.f32 0.0, %v4449_v26  ;;  %v1969_v28 = vadd.f32 -0.6931472, %v1587_v51  ;;  %v815_v12 = vmul.f32 0.6931472, %v2169_v6  ;;  %v827_v41 = vmul.f32 %v2840_v9, %v826_v21 }
  0x71   : > { %v443_v7 = vsub.f32 0.0, %v347_v38  ;;  %v349_v56 = vand.u32 2147483647, %v2944_v30  ;;  %v1970_v31 = vadd.f32 -0.6931472, %v1588_v24  ;;  %v835_v46 = vadd.f32 1.0, %v834_v18 }
  0x72   : > { %v554_v8 = vmul.f32 1.442695, %v442_v23  ;;  %1779 = vst [vmem:[%s2873_s16 + $0x48] sm:$0xff] %v1969_v28  ;;  %v444_v50 = vsub.f32 0.0, %v348_v29  ;;  %v821_v49 = vsel %vm2936_vm11, %v818_v1, %v815_v12  ;;  %v350_v19 = vand.u32 2147483647, %v2951_v25  ;;  %v2171_v9 = vpop.eup %2170 }
  0x73   : > { %v556_v63 = vmul.f32 1.442695, %v443_v7  ;;  %v445_v48 = vsub.f32 0.0, %v349_v56  ;;  %1780 = vst [vmem:[%s2873_s16 + $0x50] sm:$0xff] %v1970_v31  ;;  %v4453_v57 = vmax.f32 %v2757_v34, 0.0  ;;  %v836_v42 = vmul.f32 %v2854_v52, %v835_v46 }
  0x74   : > { %2178 = vpow2.f32 %v554_v8  ;;  %v837_v60 = vand.u32 2147483647, %v2854_v52  ;;  %v558_v13 = vmul.f32 1.442695, %v444_v50  ;;  %v351_v58 = vand.u32 2147483647, %v2964_v3 }
  0x75   : > { %v1589_v59 = vadd.f32 %v821_v49, %v4453_v57  ;;  %v824_v14 = vmul.f32 0.6931472, %v2171_v9  ;;  %2180 = vpow2.f32 %v556_v63  ;;  %v560_v0 = vmul.f32 1.442695, %v445_v48 }
  0x76   : > { %v446_v36 = vsub.f32 0.0, %v350_v19  ;;  %2182 = vpow2.f32 %v558_v13  ;;  %v447_v61 = vsub.f32 0.0, %v351_v58  ;;  %v352_v4 = vand.u32 2147483647, %v2970_v11 }
  0x77   : > { %v1971_v39 = vadd.f32 -0.6931472, %v1589_v59  ;;  %v830_v34 = vsel %vm2955_vm12, %v827_v41, %v824_v14  ;;  %2184 = vpow2.f32 %v560_v0  ;;  %v2173_v16 = vpop.eup %2172  ;;  %v4454_v1 = vmax.f32 %v2762_v40, 0.0 }
  0x78   : > { %v562_v15 = vmul.f32 1.442695, %v446_v36  ;;  %vm838_vm13 = vcmp.lt.f32.partialorder %v837_v60, 0.0004427343  ;;  %v564_v47 = vmul.f32 1.442695, %v447_v61 }
  0x79   : > { %1781 = vst [vmem:[%s2873_s16 + $0x58] sm:$0xff] %v1971_v39  ;;  %v1590_v10 = vadd.f32 %v830_v34, %v4454_v1  ;;  %v353_v21 = vand.u32 2147483647, %v2978_v44  ;;  %v833_v52 = vmul.f32 0.6931472, %v2173_v16  ;;  %v448_v37 = vsub.f32 0.0, %v352_v4 }
  0x7a   : > { %2186 = vpow2.f32 %v562_v15  ;;  %v2175_v27 = vpop.eup %2174  ;;  %v248_v51 = vmax.f32 %v2774_v54, 0.0  ;;  %v4455_v5 = vmax.f32 %v2766_v43, 0.0  ;;  %v249_v28 = vmax.f32 %v2782_v62, 0.0  ;;  %v3000_v43 = vld [vmem:[%s2708_s29 + $0xc8] sm:$0xff] }
  0x7b   : > { %v1972_v22 = vadd.f32 -0.6931472, %v1590_v10  ;;  %2188 = vpow2.f32 %v564_v47  ;;  %v839_v45 = vsel %vm838_vm13, %v836_v42, %v833_v52  ;;  %v566_v17 = vmul.f32 1.442695, %v448_v37  ;;  %v3059_v42 = vld [vmem:[%s2708_s29 + $0xd8] sm:$0xff] }
  0x7c   : > { %v449_v33 = vsub.f32 0.0, %v353_v21  ;;  %v2177_v40 = vpop.eup %2176  ;;  %v1591_v18 = vadd.f32 %v839_v45, %v4455_v5  ;;  %v840_v26 = vadd.f32 1.0, %v2175_v27  ;;  %v843_v23 = vmul.f32 -0.5, %v2175_v27 }
  0x7d   : > { %1782 = vst [vmem:[%s2873_s16 + $0x60] sm:$0xff] %v1972_v22  ;;  %v849_v32 = vadd.f32 1.0, %v2177_v40  ;;  %v852_v38 = vmul.f32 -0.5, %v2177_v40  ;;  %v250_v6 = vmax.f32 %v2795_v35, 0.0  ;;  %2190 = vpow2.f32 %v566_v17 }
  0x7e   : > { %v1973_v24 = vadd.f32 -0.6931472, %v1591_v18  ;;  %2192 = vlog2.f32 %v840_v26  ;;  %v251_v53 = vmax.f32 %v2923_v20, 0.0  ;;  %v252_v8 = vmax.f32 %v2930_v2, 0.0 }
  0x7f   : > { %v846_v12 = vand.u32 2147483647, %v2175_v27  ;;  %2194 = vlog2.f32 %v849_v32  ;;  %v253_v41 = vmax.f32 %v2944_v30, 0.0  ;;  %v568_v7 = vmul.f32 1.442695, %v449_v33 }
  0x80   : > { %1783 = vst [vmem:[%s2873_s16 + $0x68] sm:$0xff] %v1973_v24  ;;  %v844_v56 = vadd.f32 1.0, %v843_v23  ;;  %v855_v31 = vand.u32 2147483647, %v2177_v40  ;;  %v354_v50 = vand.u32 2147483647, %v2995_v55 }
  0x81   : > { %v2179_v29 = vpop.eup %2178  ;;  %v853_v49 = vadd.f32 1.0, %v852_v38  ;;  %v254_v63 = vmax.f32 %v2951_v25, 0.0  ;;  %2196 = vpow2.f32 %v568_v7  ;;  %v355_v48 = vand.u32 2147483647, %v3000_v43 }
  0x82   : > { %v858_v46 = vadd.f32 1.0, %v2179_v29  ;;  %v2181_v19 = vpop.eup %2180  ;;  %v861_v9 = vmul.f32 -0.5, %v2179_v29  ;;  %v255_v57 = vmax.f32 %v2964_v3, 0.0  ;;  %v256_v59 = vmax.f32 %v2970_v11, 0.0 }
  0x83   : > { %v2183_v60 = vpop.eup %2182  ;;  %vm3009_vm14 = vcmp.lt.f32.partialorder %v846_v12, 0.0004427343  ;;  %v864_v58 = vand.u32 2147483647, %v2179_v29  ;;  %v867_v14 = vadd.f32 1.0, %v2181_v19  ;;  %v870_v0 = vmul.f32 -0.5, %v2181_v19 }
  0x84   : > { %2198 = vlog2.f32 %v858_v46  ;;  %v2185_v36 = vpop.eup %2184  ;;  %v845_v39 = vmul.f32 %v2175_v27, %v844_v56  ;;  %vm3013_vm15 = vcmp.lt.f32.partialorder %v855_v31, 0.0004427343  ;;  %v876_v61 = vadd.f32 1.0, %v2183_v60 }
  0x85   : > { %v879_v34 = vmul.f32 -0.5, %v2183_v60  ;;  %v450_v15 = vsub.f32 0.0, %v354_v50  ;;  %v854_v4 = vmul.f32 %v2177_v40, %v853_v49  ;;  %2200 = vlog2.f32 %v867_v14 }
  0x86   : > { %v885_v16 = vadd.f32 1.0, %v2185_v36  ;;  %v451_v1 = vsub.f32 0.0, %v355_v48  ;;  %v862_v47 = vadd.f32 1.0, %v861_v9  ;;  %v873_v21 = vand.u32 2147483647, %v2181_v19 }
  0x87   : > { %v2187_v10 = vpop.eup %2186  ;;  %2202 = vlog2.f32 %v876_v61  ;;  %v888_v52 = vmul.f32 -0.5, %v2185_v36  ;;  %vm3017_vm0 = vcmp.lt.f32.partialorder %v864_v58, 0.0004427343  ;;  %v871_v27 = vadd.f32 1.0, %v870_v0 }
  0x88   : > { %v2189_v37 = vpop.eup %2188  ;;  %v882_v45 = vand.u32 2147483647, %v2183_v60  ;;  %2204 = vlog2.f32 %v885_v16  ;;  %v894_v17 = vadd.f32 1.0, %v2187_v10  ;;  %v880_v33 = vadd.f32 1.0, %v879_v34 }
  0x89   : > { %v891_v5 = vand.u32 2147483647, %v2185_v36  ;;  %v897_v40 = vmul.f32 -0.5, %v2187_v10  ;;  %v570_v18 = vmul.f32 1.442695, %v450_v15  ;;  %v889_v26 = vadd.f32 1.0, %v888_v52 }
  0x8a   : > { %2206 = vlog2.f32 %v894_v17  ;;  %v903_v23 = vadd.f32 1.0, %v2189_v37  ;;  %v906_v32 = vmul.f32 -0.5, %v2189_v37  ;;  %v2191_v38 = vpop.eup %2190  ;;  %v863_v24 = vmul.f32 %v2179_v29, %v862_v47  ;;  %v3044_v52 = vld [vmem:[%s2708_s29 + $0xd0] sm:$0xff] }
  0x8b   : > { %vm3021_vm1 = vcmp.lt.f32.partialorder %v873_v21, 0.0004427343  ;;  %v898_v7 = vadd.f32 1.0, %v897_v40  ;;  %v900_v56 = vand.u32 2147483647, %v2187_v10  ;;  %v2193_v31 = vpop.eup %2192  ;;  %v872_v46 = vmul.f32 %v2181_v19, %v871_v27 }
  0x8c   : > { %vm3025_vm2 = vcmp.lt.f32.partialorder %v882_v45, 0.0004427343  ;;  %2208 = vlog2.f32 %v903_v23  ;;  %v912_v49 = vadd.f32 1.0, %v2191_v38  ;;  %v2195_v48 = vpop.eup %2194  ;;  %v842_v9 = vmul.f32 0.6931472, %v2193_v31 }
  0x8d   : > { %v881_v58 = vmul.f32 %v2183_v60, %v880_v33  ;;  %vm3029_vm3 = vcmp.lt.f32.partialorder %v891_v5, 0.0004427343  ;;  %v909_v14 = vand.u32 2147483647, %v2189_v37  ;;  %v915_v0 = vmul.f32 -0.5, %v2191_v38 }
  0x8e   : > { %v851_v61 = vmul.f32 0.6931472, %v2195_v48  ;;  %v890_v34 = vmul.f32 %v2185_v36, %v889_v26  ;;  %v907_v15 = vadd.f32 1.0, %v906_v32  ;;  %2210 = vlog2.f32 %v912_v49  ;;  %v3033_v19 = vpop.eup %2196 }
  0x8f   : > { %v848_v16 = vsel %vm3009_vm14, %v845_v39, %v842_v9  ;;  %v3037_v47 = vmul.f32 %v2187_v10, %v898_v7  ;;  %vm3039_vm4 = vcmp.lt.f32.partialorder %v900_v56, 0.0004427343  ;;  %v918_v60 = vand.u32 2147483647, %v2191_v38  ;;  %v3072_v7 = vld [vmem:[%s2708_s29 + $0xe0] sm:$0xff] }
  0x90   : > { %2212 = vpow2.f32 %v570_v18  ;;  %v1592_v36 = vadd.f32 %v848_v16, %v248_v51  ;;  %v857_v45 = vsel %vm3013_vm15, %v854_v4, %v851_v61  ;;  %v921_v13 = vadd.f32 1.0, %v3033_v19 }
  0x91   : > { %v2199_v27 = vpop.eup %2198  ;;  %v572_v39 = vmul.f32 1.442695, %v451_v1  ;;  %v1593_v10 = vadd.f32 %v857_v45, %v249_v28  ;;  %vm3053_vm5 = vcmp.lt.f32.partialorder %v909_v14, 0.0004427343  ;;  %v916_v5 = vadd.f32 1.0, %v915_v0 }
  0x92   : > { %v860_v17 = vmul.f32 0.6931472, %v2199_v27  ;;  %v1974_v40 = vadd.f32 -0.6931472, %v1592_v36  ;;  %v908_v54 = vmul.f32 %v2189_v37, %v907_v15  ;;  %2214 = vlog2.f32 %v921_v13  ;;  %v2201_v4 = vpop.eup %2200 }
  0x93   : > { %v356_v51 = vand.u32 2147483647, %v3044_v52  ;;  %v1975_v1 = vadd.f32 -0.6931472, %v1593_v10  ;;  %vm3063_vm6 = vcmp.lt.f32.partialorder %v918_v60, 0.0004427343  ;;  %2216 = vpow2.f32 %v572_v39 }
  0x94   : > { %v866_v62 = vsel %vm3017_vm0, %v863_v24, %v860_v17  ;;  %v924_v18 = vmul.f32 -0.5, %v3033_v19  ;;  %v2203_v26 = vpop.eup %2202  ;;  %1784 = vst [vmem:[%s2873_s16 + $0x70] sm:$0xff] %v1974_v40  ;;  %v869_v23 = vmul.f32 0.6931472, %v2201_v4  ;;  %v917_v24 = vmul.f32 %v2191_v38, %v916_v5 }
  0x95   : > { %v1594_v37 = vadd.f32 %v866_v62, %v250_v6  ;;  %v452_v32 = vsub.f32 0.0, %v356_v51  ;;  %v2205_v56 = vpop.eup %2204  ;;  %1785 = vst [vmem:[%s2873_s16 + $0x78] sm:$0xff] %v1975_v1  ;;  %v878_v22 = vmul.f32 0.6931472, %v2203_v26  ;;  %v927_v31 = vand.u32 2147483647, %v3033_v19 }
  0x96   : > { %v357_v49 = vand.u32 2147483647, %v3059_v42  ;;  %v875_v9 = vsel %vm3021_vm1, %v872_v46, %v869_v23  ;;  %v887_v35 = vmul.f32 0.6931472, %v2205_v56  ;;  %v358_v38 = vand.u32 2147483647, %v3072_v7 }
  0x97   : > { %v1976_v48 = vadd.f32 -0.6931472, %v1594_v37  ;;  %v574_v6 = vmul.f32 1.442695, %v452_v32  ;;  %v2207_v14 = vpop.eup %2206  ;;  %v1595_v0 = vadd.f32 %v875_v9, %v251_v53  ;;  %v884_v61 = vsel %vm3025_vm2, %v881_v58, %v878_v22  ;;  %v3092_v58 = vld [vmem:[%s2708_s29 + $0xe8] sm:$0xff]  ;;  %v3121_v1 = vld [vmem:[%s2708_s29 + $0xf8] sm:$0xff] }
  0x98   : > { %v453_v15 = vsub.f32 0.0, %v357_v49  ;;  %v1596_v16 = vadd.f32 %v884_v61, %v252_v8  ;;  %v893_v12 = vsel %vm3029_vm3, %v890_v34, %v887_v35  ;;  %v896_v46 = vmul.f32 0.6931472, %v2207_v14  ;;  %v3136_v49 = vld [vmem:[%s2708_s29 + $0x108] sm:$0xff] }
  0x99   : > { %1786 = vst [vmem:[%s2873_s16 + $0x80] sm:$0xff] %v1976_v48  ;;  %2218 = vpow2.f32 %v574_v6  ;;  %v2209_v60 = vpop.eup %2208  ;;  %v1977_v27 = vadd.f32 -0.6931472, %v1595_v0  ;;  %v1597_v20 = vadd.f32 %v893_v12, %v253_v41  ;;  %v454_v50 = vsub.f32 0.0, %v358_v38 }
  0x9a   : > { %v576_v53 = vmul.f32 1.442695, %v453_v15  ;;  %v1978_v36 = vadd.f32 -0.6931472, %v1596_v16  ;;  %v902_v2 = vsel %vm3039_vm4, %v3037_v47, %v896_v46  ;;  %v905_v8 = vmul.f32 0.6931472, %v2209_v60 }
  0x9b   : > { %v925_v29 = vadd.f32 1.0, %v924_v18  ;;  %v2211_v34 = vpop.eup %2210  ;;  %1787 = vst [vmem:[%s2873_s16 + $0x88] sm:$0xff] %v1977_v27  ;;  %v1979_v45 = vadd.f32 -0.6931472, %v1597_v20  ;;  %v1598_v30 = vadd.f32 %v902_v2, %v254_v63  ;;  %v578_v41 = vmul.f32 1.442695, %v454_v50 }
  0x9c   : > { %2220 = vpow2.f32 %v576_v53  ;;  %1788 = vst [vmem:[%s2873_s16 + $0x90] sm:$0xff] %v1978_v36  ;;  %v911_v39 = vsel %vm3053_vm5, %v908_v54, %v905_v8  ;;  %v914_v21 = vmul.f32 0.6931472, %v2211_v34  ;;  %v359_v47 = vand.u32 2147483647, %v3092_v58  ;;  %v3115_v54 = vld [vmem:[%s2708_s29 + $0xf0] sm:$0xff] }
  0x9d   : > { %v3100_v13 = vpop.eup %2212  ;;  %1789 = vst [vmem:[%s2873_s16 + $0x98] sm:$0xff] %v1979_v45  ;;  %v1980_v10 = vadd.f32 -0.6931472, %v1598_v30  ;;  %v1599_v17 = vadd.f32 %v911_v39, %v255_v57  ;;  %v257_v25 = vmax.f32 %v2978_v44, 0.0  ;;  %v926_v33 = vmul.f32 %v3033_v19, %v925_v29  ;;  %v3143_v16 = vld [vmem:[%s2708_s29 + $0x110] sm:$0xff] }
  0x9e   : > { %v930_v63 = vadd.f32 1.0, %v3100_v13  ;;  %v920_v5 = vsel %vm3063_vm6, %v917_v24, %v914_v21  ;;  %2222 = vpow2.f32 %v578_v41  ;;  %v455_v40 = vsub.f32 0.0, %v359_v47  ;;  %v3169_v47 = vld [vmem:[%s2708_s29 + $0x118] sm:$0xff] }
  0x9f   : > { %v2215_v51 = vpop.eup %2214  ;;  %1790 = vst [vmem:[%s2873_s16 + $0xa0] sm:$0xff] %v1980_v10  ;;  %v1981_v3 = vadd.f32 -0.6931472, %v1599_v17  ;;  %v1600_v57 = vadd.f32 %v920_v5, %v256_v59  ;;  %vm928_vm7 = vcmp.lt.f32.partialorder %v927_v31, 0.0004427343  ;;  %v933_v28 = vmul.f32 -0.5, %v3100_v13 }
  0xa0   : > { %2224 = vlog2.f32 %v930_v63  ;;  %v923_v44 = vmul.f32 0.6931472, %v2215_v51  ;;  %v580_v4 = vmul.f32 1.442695, %v455_v40  ;;  %v2217_v62 = vpop.eup %2216  ;;  %v360_v18 = vand.u32 2147483647, %v3115_v54 }
  0xa1   : > { %1791 = vst [vmem:[%s2873_s16 + $0xa8] sm:$0xff] %v1981_v3  ;;  %v1982_v19 = vadd.f32 -0.6931472, %v1600_v57  ;;  %v258_v37 = vmax.f32 %v2995_v55, 0.0  ;;  %v939_v11 = vadd.f32 1.0, %v2217_v62  ;;  %v259_v22 = vmax.f32 %v3000_v43, 0.0 }
  0xa2   : > { %v929_v26 = vsel %vm928_vm7, %v926_v33, %v923_v44  ;;  %2226 = vpow2.f32 %v580_v4  ;;  %v456_v23 = vsub.f32 0.0, %v360_v18  ;;  %v361_v32 = vand.u32 2147483647, %v3121_v1  ;;  %v3133_v31 = vld [vmem:[%s2708_s29 + $0x100] sm:$0xff] }
  0xa3   : > { %1792 = vst [vmem:[%s2873_s16 + $0xb0] sm:$0xff] %v1982_v19  ;;  %v1601_v59 = vadd.f32 %v929_v26, %v257_v25  ;;  %v936_v56 = vand.u32 2147483647, %v3100_v13  ;;  %2228 = vlog2.f32 %v939_v11  ;;  %v260_v24 = vmax.f32 %v3044_v52, 0.0 }
  0xa4   : > { %v934_v35 = vadd.f32 1.0, %v933_v28  ;;  %v582_v6 = vmul.f32 1.442695, %v456_v23  ;;  %v457_v14 = vsub.f32 0.0, %v361_v32  ;;  %v942_v0 = vmul.f32 -0.5, %v2217_v62  ;;  %v3188_v23 = vld [vmem:[%s2708_s29 + $0x120] sm:$0xff] }
  0xa5   : > { %v1983_v9 = vadd.f32 -0.6931472, %v1601_v59  ;;  %v945_v61 = vand.u32 2147483647, %v2217_v62  ;;  %v261_v38 = vmax.f32 %v3059_v42, 0.0  ;;  %v262_v20 = vmax.f32 %v3072_v7, 0.0 }
  0xa6   : > { %v3138_v48 = vpop.eup %2218  ;;  %2230 = vpow2.f32 %v582_v6  ;;  %v584_v12 = vmul.f32 1.442695, %v457_v14  ;;  %v362_v46 = vand.u32 2147483647, %v3133_v31  ;;  %v363_v60 = vand.u32 2147483647, %v3136_v49 }
  0xa7   : > { %v948_v15 = vadd.f32 1.0, %v3138_v48  ;;  %1793 = vst [vmem:[%s2873_s16 + $0xb8] sm:$0xff] %v1983_v9  ;;  %v263_v53 = vmax.f32 %v3092_v58, 0.0  ;;  %v264_v50 = vmax.f32 %v3115_v54, 0.0  ;;  %v935_v36 = vmul.f32 %v3100_v13, %v934_v35  ;;  %v3193_v6 = vld [vmem:[%s2708_s29 + $0x128] sm:$0xff] }
  0xa8   : > { %vm3154_vm8 = vcmp.lt.f32.partialorder %v936_v56, 0.0004427343  ;;  %v943_v29 = vadd.f32 1.0, %v942_v0  ;;  %v458_v34 = vsub.f32 0.0, %v362_v46  ;;  %v459_v45 = vsub.f32 0.0, %v363_v60 }
  0xa9   : > { %v3148_v27 = vpop.eup %2220  ;;  %2232 = vlog2.f32 %v948_v15  ;;  %v364_v30 = vand.u32 2147483647, %v3143_v16  ;;  %vm3162_vm9 = vcmp.lt.f32.partialorder %v945_v61, 0.0004427343  ;;  %v951_v13 = vmul.f32 -0.5, %v3138_v48 }
  0xaa   : > { %v957_v8 = vadd.f32 1.0, %v3148_v27  ;;  %2234 = vpow2.f32 %v584_v12  ;;  %v265_v21 = vmax.f32 %v3121_v1, 0.0  ;;  %v954_v17 = vand.u32 2147483647, %v3138_v48 }
  0xab   : > { %v3160_v41 = vpop.eup %2222  ;;  %v266_v63 = vmax.f32 %v3133_v31, 0.0  ;;  %v586_v5 = vmul.f32 1.442695, %v458_v34  ;;  %v960_v40 = vmul.f32 -0.5, %v3148_v27  ;;  %v588_v51 = vmul.f32 1.442695, %v459_v45 }
  0xac   : > { %2236 = vlog2.f32 %v957_v8  ;;  %v966_v25 = vadd.f32 1.0, %v3160_v41  ;;  %v460_v3 = vsub.f32 0.0, %v364_v30  ;;  %v944_v57 = vmul.f32 %v2217_v62, %v943_v29 }
  0xad   : > { %v2225_v10 = vpop.eup %2224  ;;  %v267_v44 = vmax.f32 %v3136_v49, 0.0  ;;  %v365_v4 = vand.u32 2147483647, %v3169_v47  ;;  %v952_v28 = vadd.f32 1.0, %v951_v13  ;;  %vm3183_vm10 = vcmp.lt.f32.partialorder %v954_v17, 0.0004427343 }
  0xae   : > { %v932_v33 = vmul.f32 0.6931472, %v2225_v10  ;;  %2238 = vlog2.f32 %v966_v25  ;;  %v590_v18 = vmul.f32 1.442695, %v460_v3  ;;  %v961_v56 = vadd.f32 1.0, %v960_v40 }
  0xaf   : > { %2240 = vpow2.f32 %v586_v5  ;;  %v3179_v26 = vpop.eup %2226  ;;  %v461_v62 = vsub.f32 0.0, %v365_v4  ;;  %v969_v9 = vmul.f32 -0.5, %v3160_v41  ;;  %v953_v0 = vmul.f32 %v3138_v48, %v952_v28 }
  0xb0   : > { %v938_v19 = vsel %vm3154_vm8, %v935_v36, %v932_v33  ;;  %2242 = vpow2.f32 %v588_v51  ;;  %v2229_v32 = vpop.eup %2228  ;;  %v975_v35 = vadd.f32 1.0, %v3179_v26  ;;  %v963_v61 = vand.u32 2147483647, %v3148_v27 }
  0xb1   : > { %v1602_v11 = vadd.f32 %v938_v19, %v258_v37  ;;  %2244 = vpow2.f32 %v590_v18  ;;  %v941_v37 = vmul.f32 0.6931472, %v2229_v32  ;;  %v592_v14 = vmul.f32 1.442695, %v461_v62 }
  0xb2   : > { %2246 = vlog2.f32 %v975_v35  ;;  %v366_v15 = vand.u32 2147483647, %v3188_v23  ;;  %v972_v60 = vand.u32 2147483647, %v3160_v41  ;;  %v367_v36 = vand.u32 2147483647, %v3193_v6 }
  0xb3   : > { %v1984_v55 = vadd.f32 -0.6931472, %v1602_v11  ;;  %v3198_v12 = vpop.eup %2230  ;;  %v947_v46 = vsel %vm3162_vm9, %v944_v57, %v941_v37  ;;  %2248 = vpow2.f32 %v592_v14  ;;  %v962_v8 = vmul.f32 %v3148_v27, %v961_v56 }
  0xb4   : > { %v1603_v48 = vadd.f32 %v947_v46, %v259_v22  ;;  %v970_v29 = vadd.f32 1.0, %v969_v9  ;;  %v984_v34 = vadd.f32 1.0, %v3198_v12  ;;  %v978_v39 = vmul.f32 -0.5, %v3179_v26 }
  0xb5   : > { %1794 = vst [vmem:[%s2873_s16 + $0xc0] sm:$0xff] %v1984_v55  ;;  %v981_v13 = vand.u32 2147483647, %v3179_v26  ;;  %v462_v10 = vsub.f32 0.0, %v366_v15  ;;  %v463_v5 = vsub.f32 0.0, %v367_v36  ;;  %v268_v40 = vmax.f32 %v3143_v16, 0.0 }
  0xb6   : > { %v2233_v2 = vpop.eup %2232  ;;  %v1985_v17 = vadd.f32 -0.6931472, %v1603_v48  ;;  %2250 = vlog2.f32 %v984_v34  ;;  %vm3213_vm11 = vcmp.lt.f32.partialorder %v963_v61, 0.0004427343  ;;  %vm3217_vm12 = vcmp.lt.f32.partialorder %v972_v60, 0.0004427343 }
  0xb7   : > { %v2235_v45 = vpop.eup %2234  ;;  %v950_v30 = vmul.f32 0.6931472, %v2233_v2  ;;  %v987_v57 = vmul.f32 -0.5, %v3198_v12  ;;  %v971_v4 = vmul.f32 %v3160_v41, %v970_v29  ;;  %v979_v19 = vadd.f32 1.0, %v978_v39 }
  0xb8   : > { %v993_v25 = vadd.f32 1.0, %v2235_v45  ;;  %1795 = vst [vmem:[%s2873_s16 + $0xc8] sm:$0xff] %v1985_v17  ;;  %v996_v28 = vmul.f32 -0.5, %v2235_v45  ;;  %v594_v18 = vmul.f32 1.442695, %v462_v10 }
  0xb9   : > { %v2237_v33 = vpop.eup %2236  ;;  %v956_v43 = vsel %vm3183_vm10, %v953_v0, %v950_v30  ;;  %vm3229_vm13 = vcmp.lt.f32.partialorder %v981_v13, 0.0004427343  ;;  %v596_v52 = vmul.f32 1.442695, %v463_v5  ;;  %v990_v41 = vand.u32 2147483647, %v3198_v12 }
  0xba   : > { %v1604_v51 = vadd.f32 %v956_v43, %v260_v24  ;;  %v959_v3 = vmul.f32 0.6931472, %v2237_v33  ;;  %2252 = vlog2.f32 %v993_v25  ;;  %v988_v55 = vadd.f32 1.0, %v987_v57  ;;  %v3240_v0 = vld [vmem:[%s2708_s29 + $0x130] sm:$0xff] }
  0xbb   : > { %v2239_v11 = vpop.eup %2238  ;;  %2254 = vpow2.f32 %v594_v18  ;;  %v999_v37 = vand.u32 2147483647, %v2235_v45  ;;  %v980_v36 = vmul.f32 %v3179_v26, %v979_v19  ;;  %v368_v34 = vand.u32 2147483647, %v3240_v0 }
  0xbc   : > { %v1986_v59 = vadd.f32 -0.6931472, %v1604_v51  ;;  %v965_v62 = vsel %vm3213_vm11, %v962_v8, %v959_v3  ;;  %v2241_v24 = vpop.eup %2240  ;;  %v968_v9 = vmul.f32 0.6931472, %v2239_v11  ;;  %2256 = vpow2.f32 %v596_v52  ;;  %v3277_v51 = vld [vmem:[%s2708_s29 + $0x138] sm:$0xff] }
  0xbd   : > { %v1605_v56 = vadd.f32 %v965_v62, %v261_v38  ;;  %v3236_v35 = vpop.eup %2242  ;;  %v1002_v14 = vadd.f32 1.0, %v2241_v24  ;;  %v997_v38 = vadd.f32 1.0, %v996_v28  ;;  %v1005_v2 = vmul.f32 -0.5, %v2241_v24 }
  0xbe   : > { %1796 = vst [vmem:[%s2873_s16 + $0xd0] sm:$0xff] %v1986_v59  ;;  %v3242_v61 = vpop.eup %2244  ;;  %v974_v42 = vsel %vm3217_vm12, %v971_v4, %v968_v9  ;;  %v1011_v46 = vadd.f32 1.0, %v3236_v35  ;;  %v1008_v8 = vand.u32 2147483647, %v2241_v24  ;;  %vm3255_vm14 = vcmp.lt.f32.partialorder %v990_v41, 0.0004427343 }
  0xbf   : > { %v1987_v15 = vadd.f32 -0.6931472, %v1605_v56  ;;  %v1606_v60 = vadd.f32 %v974_v42, %v262_v20  ;;  %2258 = vlog2.f32 %v1002_v14  ;;  %v2247_v48 = vpop.eup %2246  ;;  %v1020_v29 = vadd.f32 1.0, %v3242_v61  ;;  %v3290_v41 = vld [vmem:[%s2708_s29 + $0x140] sm:$0xff] }
  0xc0   : > { %2260 = vlog2.f32 %v1011_v46  ;;  %v3253_v30 = vpop.eup %2248  ;;  %v977_v13 = vmul.f32 0.6931472, %v2247_v48  ;;  %v989_v20 = vmul.f32 %v3198_v12, %v988_v55  ;;  %v998_v26 = vmul.f32 %v2235_v45, %v997_v38  ;;  %v3293_v55 = vld [vmem:[%s2708_s29 + $0x148] sm:$0xff] }
  0xc1   : > { %1797 = vst [vmem:[%s2873_s16 + $0xd8] sm:$0xff] %v1987_v15  ;;  %v1988_v39 = vadd.f32 -0.6931472, %v1606_v60  ;;  %vm3260_vm15 = vcmp.lt.f32.partialorder %v999_v37, 0.0004427343  ;;  %2262 = vlog2.f32 %v1020_v29  ;;  %v1006_v25 = vadd.f32 1.0, %v1005_v2 }
  0xc2   : > { %v983_v17 = vsel %vm3229_vm13, %v980_v36, %v977_v13  ;;  %v1014_v5 = vmul.f32 -0.5, %v3236_v35  ;;  %v1029_v33 = vadd.f32 1.0, %v3253_v30  ;;  %vm3271_vm0 = vcmp.lt.f32.partialorder %v1008_v8, 0.0004427343 }
  0xc3   : > { %1798 = vst [vmem:[%s2873_s16 + $0xe0] sm:$0xff] %v1988_v39  ;;  %v2251_v43 = vpop.eup %2250  ;;  %v1607_v22 = vadd.f32 %v983_v17, %v263_v53  ;;  %v1023_v45 = vmul.f32 -0.5, %v3242_v61  ;;  %v464_v27 = vsub.f32 0.0, %v368_v34  ;;  %v1017_v57 = vand.u32 2147483647, %v3236_v35 }
  0xc4   : > { %v986_v3 = vmul.f32 0.6931472, %v2251_v43  ;;  %v1026_v4 = vand.u32 2147483647, %v3242_v61  ;;  %2264 = vlog2.f32 %v1029_v33  ;;  %v269_v19 = vmax.f32 %v3169_v47, 0.0 }
  0xc5   : > { %v1989_v53 = vadd.f32 -0.6931472, %v1607_v22  ;;  %v1032_v28 = vmul.f32 -0.5, %v3253_v30  ;;  %v598_v18 = vmul.f32 1.442695, %v464_v27  ;;  %v1007_v62 = vmul.f32 %v2241_v24, %v1006_v25  ;;  %v3331_v22 = vld [vmem:[%s2708_s29 + $0x150] sm:$0xff] }
  0xc6   : > { %v992_v11 = vsel %vm3255_vm14, %v989_v20, %v986_v3  ;;  %v1015_v32 = vadd.f32 1.0, %v1014_v5  ;;  %v1024_v56 = vadd.f32 1.0, %v1023_v45  ;;  %v369_v9 = vand.u32 2147483647, %v3277_v51  ;;  %v3338_v3 = vld [vmem:[%s2708_s29 + $0x158] sm:$0xff] }
  0xc7   : > { %v2253_v58 = vpop.eup %2252  ;;  %1799 = vst [vmem:[%s2873_s16 + $0xe8] sm:$0xff] %v1989_v53  ;;  %v1608_v52 = vadd.f32 %v992_v11, %v264_v50  ;;  %2266 = vpow2.f32 %v598_v18  ;;  %vm3299_vm1 = vcmp.lt.f32.partialorder %v1017_v57, 0.0004427343  ;;  %vm3303_vm2 = vcmp.lt.f32.partialorder %v1026_v4, 0.0004427343  ;;  %v3347_v11 = vld [vmem:[%s2708_s29 + $0x160] sm:$0xff] }
  0xc8   : > { %v995_v59 = vmul.f32 0.6931472, %v2253_v58  ;;  %v3295_v37 = vpop.eup %2254  ;;  %v1035_v50 = vand.u32 2147483647, %v3253_v30  ;;  %v1033_v46 = vadd.f32 1.0, %v1032_v28  ;;  %v1016_v36 = vmul.f32 %v3236_v35, %v1015_v32 }
  0xc9   : > { %v3308_v15 = vpop.eup %2256  ;;  %v1990_v42 = vadd.f32 -0.6931472, %v1608_v52  ;;  %v1038_v60 = vadd.f32 1.0, %v3295_v37  ;;  %v370_v48 = vand.u32 2147483647, %v3290_v41  ;;  %v1025_v39 = vmul.f32 %v3242_v61, %v1024_v56  ;;  %v3354_v56 = vld [vmem:[%s2708_s29 + $0x168] sm:$0xff] }
  0xca   : > { %v1001_v14 = vsel %vm3260_vm15, %v998_v26, %v995_v59  ;;  %v1047_v2 = vadd.f32 1.0, %v3308_v15  ;;  %v371_v8 = vand.u32 2147483647, %v3293_v55  ;;  %v465_v1 = vsub.f32 0.0, %v369_v9 }
  0xcb   : > { %v1609_v38 = vadd.f32 %v1001_v14, %v265_v21  ;;  %1800 = vst [vmem:[%s2873_s16 + $0xf0] sm:$0xff] %v1990_v42  ;;  %2268 = vlog2.f32 %v1038_v60  ;;  %vm3319_vm3 = vcmp.lt.f32.partialorder %v1035_v50, 0.0004427343  ;;  %v1041_v35 = vmul.f32 -0.5, %v3295_v37 }
  0xcc   : > { %v2259_v29 = vpop.eup %2258  ;;  %2270 = vlog2.f32 %v1047_v2  ;;  %v1034_v26 = vmul.f32 %v3253_v30, %v1033_v46  ;;  %v1044_v10 = vand.u32 2147483647, %v3295_v37  ;;  %v600_v61 = vmul.f32 1.442695, %v465_v1  ;;  %v3372_v46 = vld [vmem:[%s2708_s29 + $0x170] sm:$0xff] }
  0xcd   : > { %v1991_v34 = vadd.f32 -0.6931472, %v1609_v38  ;;  %v2261_v21 = vpop.eup %2260  ;;  %v1004_v13 = vmul.f32 0.6931472, %v2259_v29  ;;  %v1050_v5 = vmul.f32 -0.5, %v3308_v15  ;;  %v466_v33 = vsub.f32 0.0, %v370_v48 }
  0xce   : > { %v1013_v20 = vmul.f32 0.6931472, %v2261_v21  ;;  %v2263_v17 = vpop.eup %2262  ;;  %v467_v43 = vsub.f32 0.0, %v371_v8  ;;  %2272 = vpow2.f32 %v600_v61  ;;  %v1053_v57 = vand.u32 2147483647, %v3308_v15 }
  0xcf   : > { %1801 = vst [vmem:[%s2873_s16 + $0xf8] sm:$0xff] %v1991_v34  ;;  %v1010_v25 = vsel %vm3271_vm0, %v1007_v62, %v1004_v13  ;;  %v1022_v27 = vmul.f32 0.6931472, %v2263_v17  ;;  %v602_v4 = vmul.f32 1.442695, %v466_v33  ;;  %v1051_v62 = vadd.f32 1.0, %v1050_v5 }
  0xd0   : > { %v1610_v45 = vadd.f32 %v1010_v25, %v266_v63  ;;  %v1019_v30 = vsel %vm3299_vm1, %v1016_v36, %v1013_v20  ;;  %v604_v58 = vmul.f32 1.442695, %v467_v43  ;;  %v1042_v63 = vadd.f32 1.0, %v1041_v35 }
  0xd1   : > { %v1611_v12 = vadd.f32 %v1019_v30, %v267_v44  ;;  %v2265_v53 = vpop.eup %2264  ;;  %v1028_v31 = vsel %vm3303_vm2, %v1025_v39, %v1022_v27  ;;  %v372_v18 = vand.u32 2147483647, %v3331_v22  ;;  %2274 = vpow2.f32 %v602_v4  ;;  %v3382_v39 = vld [vmem:[%s2708_s29 + $0x178] sm:$0xff] }
  0xd2   : > { %v1992_v28 = vadd.f32 -0.6931472, %v1610_v45  ;;  %v1612_v49 = vadd.f32 %v1028_v31, %v268_v40  ;;  %v1031_v44 = vmul.f32 0.6931472, %v2265_v53  ;;  %2276 = vpow2.f32 %v604_v58 }
  0xd3   : > { %v1993_v59 = vadd.f32 -0.6931472, %v1611_v12  ;;  %v468_v32 = vsub.f32 0.0, %v372_v18  ;;  %v373_v52 = vand.u32 2147483647, %v3338_v3  ;;  %v270_v40 = vmax.f32 %v3188_v23, 0.0 }
  0xd4   : > { %1802 = vst [vmem:[%s2873_s16 + $0x100] sm:$0xff] %v1992_v28  ;;  %v3356_v9 = vpop.eup %2266  ;;  %v1994_v14 = vadd.f32 -0.6931472, %v1612_v49  ;;  %v1037_v16 = vsel %vm3319_vm3, %v1034_v26, %v1031_v44  ;;  %v374_v24 = vand.u32 2147483647, %v3347_v11  ;;  %v1043_v50 = vmul.f32 %v3295_v37, %v1042_v63 }
  0xd5   : > { %1803 = vst [vmem:[%s2873_s16 + $0x108] sm:$0xff] %v1993_v59  ;;  %v1613_v54 = vadd.f32 %v1037_v16, %v269_v19  ;;  %vm3366_vm4 = vcmp.lt.f32.partialorder %v1044_v10, 0.0004427343  ;;  %v1056_v38 = vadd.f32 1.0, %v3356_v9  ;;  %v606_v60 = vmul.f32 1.442695, %v468_v32 }
  0xd6   : > { %1804 = vst [vmem:[%s2873_s16 + $0x110] sm:$0xff] %v1994_v14  ;;  %v469_v23 = vsub.f32 0.0, %v373_v52  ;;  %v470_v36 = vsub.f32 0.0, %v374_v24  ;;  %v375_v2 = vand.u32 2147483647, %v3354_v56  ;;  %v1052_v19 = vmul.f32 %v3308_v15, %v1051_v62  ;;  %v3402_v59 = vld [vmem:[%s2708_s29 + $0x180] sm:$0xff] }
  0xd7   : > { %v1995_v47 = vadd.f32 -0.6931472, %v1613_v54  ;;  %vm3377_vm5 = vcmp.lt.f32.partialorder %v1053_v57, 0.0004427343  ;;  %2278 = vlog2.f32 %v1056_v38  ;;  %v271_v13 = vmax.f32 %v3193_v6, 0.0 }
  0xd8   : > { %v2269_v48 = vpop.eup %2268  ;;  %2280 = vpow2.f32 %v606_v60  ;;  %v608_v8 = vmul.f32 1.442695, %v469_v23  ;;  %v610_v29 = vmul.f32 1.442695, %v470_v36  ;;  %v471_v34 = vsub.f32 0.0, %v375_v2 }
  0xd9   : > { %v2271_v1 = vpop.eup %2270  ;;  %1805 = vst [vmem:[%s2873_s16 + $0x118] sm:$0xff] %v1995_v47  ;;  %v1040_v21 = vmul.f32 0.6931472, %v2269_v48  ;;  %v1059_v7 = vmul.f32 -0.5, %v3356_v9  ;;  %v376_v15 = vand.u32 2147483647, %v3372_v46 }
  0xda   : > { %v1049_v35 = vmul.f32 0.6931472, %v2271_v1  ;;  %2282 = vpow2.f32 %v608_v8  ;;  %v612_v20 = vmul.f32 1.442695, %v471_v34  ;;  %v377_v61 = vand.u32 2147483647, %v3382_v39 }
  0xdb   : > { %v1046_v26 = vsel %vm3366_vm4, %v1043_v50, %v1040_v21  ;;  %2284 = vpow2.f32 %v610_v29  ;;  %v472_v10 = vsub.f32 0.0, %v376_v15  ;;  %v2273_v17 = vpop.eup %2272  ;;  %v272_v33 = vmax.f32 %v3240_v0, 0.0  ;;  %v3425_v29 = vld [vmem:[%s2708_s29 + $0x188] sm:$0xff]  ;;  %v3436_v15 = vld [vmem:[%s2708_s29 + $0x190] sm:$0xff] }
  0xdc   : > { %v1614_v25 = vadd.f32 %v1046_v26, %v270_v40  ;;  %v1055_v5 = vsel %vm3377_vm5, %v1052_v19, %v1049_v35  ;;  %2286 = vpow2.f32 %v612_v20  ;;  %v1060_v43 = vadd.f32 1.0, %v1059_v7 }
  0xdd   : > { %v1615_v6 = vadd.f32 %v1055_v5, %v271_v13  ;;  %v1065_v45 = vadd.f32 1.0, %v2273_v17  ;;  %v273_v27 = vmax.f32 %v3277_v51, 0.0  ;;  %v614_v12 = vmul.f32 1.442695, %v472_v10 }
  0xde   : > { %v1996_v30 = vadd.f32 -0.6931472, %v1614_v25  ;;  %v473_v57 = vsub.f32 0.0, %v377_v61  ;;  %v2275_v4 = vpop.eup %2274  ;;  %v1068_v53 = vmul.f32 -0.5, %v2273_v17  ;;  %v274_v28 = vmax.f32 %v3290_v41, 0.0  ;;  %v3495_v41 = vld [vmem:[%s2708_s29 + $0x1a8] sm:$0xff] }
  0xdf   : > { %v1997_v58 = vadd.f32 -0.6931472, %v1615_v6  ;;  %2288 = vlog2.f32 %v1065_v45  ;;  %v3396_v31 = vpop.eup %2276  ;;  %v1062_v0 = vand.u32 2147483647, %v3356_v9  ;;  %v1074_v63 = vadd.f32 1.0, %v2275_v4 }
  0xe0   : > { %1806 = vst [vmem:[%s2873_s16 + $0x120] sm:$0xff] %v1996_v30  ;;  %v275_v18 = vmax.f32 %v3293_v55, 0.0  ;;  %2290 = vpow2.f32 %v614_v12  ;;  %v1061_v49 = vmul.f32 %v3356_v9, %v1060_v43  ;;  %v1083_v44 = vadd.f32 1.0, %v3396_v31 }
  0xe1   : > { %1807 = vst [vmem:[%s2873_s16 + $0x128] sm:$0xff] %v1997_v58  ;;  %v276_v62 = vmax.f32 %v3331_v22, 0.0  ;;  %v277_v32 = vmax.f32 %v3338_v3, 0.0  ;;  %v1071_v52 = vand.u32 2147483647, %v2273_v17  ;;  %2292 = vlog2.f32 %v1074_v63  ;;  %v3537_v3 = vld [vmem:[%s2708_s29 + $0x1b8] sm:$0xff] }
  0xe2   : > { %v1077_v14 = vmul.f32 -0.5, %v2275_v4  ;;  %v616_v16 = vmul.f32 1.442695, %v473_v57  ;;  %v1069_v40 = vadd.f32 1.0, %v1068_v53  ;;  %v1080_v24 = vand.u32 2147483647, %v2275_v4 }
  0xe3   : > { %2294 = vlog2.f32 %v1083_v44  ;;  %v378_v54 = vand.u32 2147483647, %v3402_v59  ;;  %vm3410_vm6 = vcmp.lt.f32.partialorder %v1062_v0, 0.0004427343  ;;  %v1086_v9 = vmul.f32 -0.5, %v3396_v31 }
  0xe4   : > { %v2279_v50 = vpop.eup %2278  ;;  %v278_v38 = vmax.f32 %v3347_v11, 0.0  ;;  %2296 = vpow2.f32 %v616_v16  ;;  %v1089_v36 = vand.u32 2147483647, %v3396_v31  ;;  %v279_v2 = vmax.f32 %v3354_v56, 0.0 }
  0xe5   : > { %v2281_v60 = vpop.eup %2280  ;;  %v1058_v23 = vmul.f32 0.6931472, %v2279_v50  ;;  %v280_v47 = vmax.f32 %v3372_v46, 0.0  ;;  %vm3419_vm7 = vcmp.lt.f32.partialorder %v1071_v52, 0.0004427343  ;;  %v1078_v37 = vadd.f32 1.0, %v1077_v14 }
  0xe6   : > { %v1092_v48 = vadd.f32 1.0, %v2281_v60  ;;  %v281_v8 = vmax.f32 %v3382_v39, 0.0  ;;  %v1070_v21 = vmul.f32 %v2273_v17, %v1069_v40  ;;  %vm3431_vm8 = vcmp.lt.f32.partialorder %v1080_v24, 0.0004427343 }
  0xe7   : > { %v3427_v34 = vpop.eup %2282  ;;  %v1064_v1 = vsel %vm3410_vm6, %v1061_v49, %v1058_v23  ;;  %v474_v7 = vsub.f32 0.0, %v378_v54  ;;  %v1087_v26 = vadd.f32 1.0, %v1086_v9  ;;  %v1095_v10 = vmul.f32 -0.5, %v2281_v60 }
  0xe8   : > { %v2285_v35 = vpop.eup %2284  ;;  %v1616_v20 = vadd.f32 %v1064_v1, %v272_v33  ;;  %2298 = vlog2.f32 %v1092_v48  ;;  %vm3440_vm9 = vcmp.lt.f32.partialorder %v1089_v36, 0.0004427343  ;;  %v1101_v17 = vadd.f32 1.0, %v3427_v34 }
  0xe9   : > { %v3438_v61 = vpop.eup %2286  ;;  %v1110_v5 = vadd.f32 1.0, %v2285_v35  ;;  %v379_v6 = vand.u32 2147483647, %v3425_v29  ;;  %v1079_v45 = vmul.f32 %v2275_v4, %v1078_v37  ;;  %v1098_v30 = vand.u32 2147483647, %v2281_v60 }
  0xea   : > { %v1998_v43 = vadd.f32 -0.6931472, %v1616_v20  ;;  %v380_v33 = vand.u32 2147483647, %v3436_v15  ;;  %2300 = vlog2.f32 %v1101_v17  ;;  %v1104_v12 = vmul.f32 -0.5, %v3427_v34 }
  0xeb   : > { %v1119_v57 = vadd.f32 1.0, %v3438_v61  ;;  %v618_v58 = vmul.f32 1.442695, %v474_v7  ;;  %v1096_v0 = vadd.f32 1.0, %v1095_v10  ;;  %v1107_v63 = vand.u32 2147483647, %v3427_v34 }
  0xec   : > { %v2289_v53 = vpop.eup %2288  ;;  %1808 = vst [vmem:[%s2873_s16 + $0x130] sm:$0xff] %v1998_v43  ;;  %2302 = vlog2.f32 %v1110_v5  ;;  %v1113_v49 = vmul.f32 -0.5, %v2285_v35  ;;  %v1116_v4 = vand.u32 2147483647, %v2285_v35  ;;  %v1122_v14 = vmul.f32 -0.5, %v3438_v61 }
  0xed   : > { %v3451_v44 = vpop.eup %2290  ;;  %v1067_v52 = vmul.f32 0.6931472, %v2289_v53  ;;  %2304 = vlog2.f32 %v1119_v57  ;;  %v1088_v16 = vmul.f32 %v3396_v31, %v1087_v26  ;;  %v475_v24 = vsub.f32 0.0, %v379_v6  ;;  %v3492_v57 = vld [vmem:[%s2708_s29 + $0x1a0] sm:$0xff] }
  0xee   : > { %v1128_v40 = vadd.f32 1.0, %v3451_v44  ;;  %v476_v54 = vsub.f32 0.0, %v380_v33  ;;  %v2293_v50 = vpop.eup %2292  ;;  %vm3458_vm10 = vcmp.lt.f32.partialorder %v1098_v30, 0.0004427343  ;;  %v1105_v23 = vadd.f32 1.0, %v1104_v12  ;;  %v3486_v33 = vld [vmem:[%s2708_s29 + $0x198] sm:$0xff] }
  0xef   : > { %v1073_v42 = vsel %vm3419_vm7, %v1070_v21, %v1067_v52  ;;  %2306 = vpow2.f32 %v618_v58  ;;  %v1076_v48 = vmul.f32 0.6931472, %v2293_v50  ;;  %vm3464_vm11 = vcmp.lt.f32.partialorder %v1107_v63, 0.0004427343  ;;  %v3555_v53 = vld [vmem:[%s2708_s29 + $0x1c0] sm:$0xff] }
  0xf0   : > { %v2295_v36 = vpop.eup %2294  ;;  %v1617_v37 = vadd.f32 %v1073_v42, %v273_v27  ;;  %v1114_v1 = vadd.f32 1.0, %v1113_v49  ;;  %2308 = vlog2.f32 %v1128_v40  ;;  %v1097_v7 = vmul.f32 %v2281_v60, %v1096_v0 }
  0xf1   : > { %v3468_v19 = vpop.eup %2296  ;;  %v1085_v21 = vmul.f32 0.6931472, %v2295_v36  ;;  %vm3470_vm12 = vcmp.lt.f32.partialorder %v1116_v4, 0.0004427343  ;;  %v1123_v26 = vadd.f32 1.0, %v1122_v14  ;;  %v1082_v10 = vsel %vm3431_vm8, %v1079_v45, %v1076_v48 }
  0xf2   : > { %v1125_v51 = vand.u32 2147483647, %v3438_v61  ;;  %v1999_v27 = vadd.f32 -0.6931472, %v1617_v37  ;;  %v1131_v17 = vmul.f32 -0.5, %v3451_v44  ;;  %v1137_v5 = vadd.f32 1.0, %v3468_v19 }
  0xf3   : > { %v1618_v60 = vadd.f32 %v1082_v10, %v274_v28  ;;  %v1091_v6 = vsel %vm3440_vm9, %v1088_v16, %v1085_v21  ;;  %v1106_v43 = vmul.f32 %v3427_v34, %v1105_v23  ;;  %v1134_v30 = vand.u32 2147483647, %v3451_v44  ;;  %v3498_v28 = vld [vmem:[%s2708_s29 + $0x1b0] sm:$0xff] }
  0xf4   : > { %1809 = vst [vmem:[%s2873_s16 + $0x138] sm:$0xff] %v1999_v27  ;;  %v1619_v13 = vadd.f32 %v1091_v6, %v275_v18  ;;  %v1115_v45 = vmul.f32 %v2285_v35, %v1114_v1  ;;  %2310 = vlog2.f32 %v1137_v5  ;;  %v620_v12 = vmul.f32 1.442695, %v475_v24 }
  0xf5   : > { %v2299_v34 = vpop.eup %2298  ;;  %v2000_v25 = vadd.f32 -0.6931472, %v1618_v60  ;;  %v1124_v58 = vmul.f32 %v3438_v61, %v1123_v26  ;;  %vm3501_vm13 = vcmp.lt.f32.partialorder %v1125_v51, 0.0004427343  ;;  %v622_v55 = vmul.f32 1.442695, %v476_v54 }
  0xf6   : > { %v2001_v18 = vadd.f32 -0.6931472, %v1619_v13  ;;  %v1094_v35 = vmul.f32 0.6931472, %v2299_v34  ;;  %v1132_v0 = vadd.f32 1.0, %v1131_v17  ;;  %2312 = vpow2.f32 %v620_v12 }
  0xf7   : > { %1810 = vst [vmem:[%s2873_s16 + $0x140] sm:$0xff] %v2000_v25  ;;  %vm3506_vm14 = vcmp.lt.f32.partialorder %v1134_v30, 0.0004427343  ;;  %2314 = vpow2.f32 %v622_v55  ;;  %v381_v49 = vand.u32 2147483647, %v3486_v33  ;;  %v2301_v61 = vpop.eup %2300  ;;  %v1140_v14 = vmul.f32 -0.5, %v3468_v19 }
  0xf8   : > { %v382_v52 = vand.u32 2147483647, %v3492_v57  ;;  %1811 = vst [vmem:[%s2873_s16 + $0x148] sm:$0xff] %v2001_v18  ;;  %v1100_v4 = vsel %vm3458_vm10, %v1097_v7, %v1094_v35  ;;  %v383_v16 = vand.u32 2147483647, %v3495_v41  ;;  %v1133_v48 = vmul.f32 %v3451_v44, %v1132_v0 }
  0xf9   : > { %v384_v40 = vand.u32 2147483647, %v3498_v28  ;;  %v2303_v24 = vpop.eup %2302  ;;  %v1620_v54 = vadd.f32 %v1100_v4, %v276_v62  ;;  %v1103_v50 = vmul.f32 0.6931472, %v2301_v61  ;;  %v477_v42 = vsub.f32 0.0, %v381_v49 }
  0xfa   : > { %v478_v23 = vsub.f32 0.0, %v382_v52  ;;  %v2305_v36 = vpop.eup %2304  ;;  %v1112_v37 = vmul.f32 0.6931472, %v2303_v24  ;;  %v1143_v9 = vand.u32 2147483647, %v3468_v19  ;;  %v479_v1 = vsub.f32 0.0, %v383_v16 }
  0xfb   : > { %v2002_v21 = vadd.f32 -0.6931472, %v1620_v54  ;;  %v1109_v7 = vsel %vm3464_vm11, %v1106_v43, %v1103_v50  ;;  %v1121_v26 = vmul.f32 0.6931472, %v2305_v36  ;;  %v480_v51 = vsub.f32 0.0, %v384_v40  ;;  %v3569_v54 = vld [vmem:[%s2708_s29 + $0x1c8] sm:$0xff] }
  0xfc   : > { %v3524_v22 = vpop.eup %2306  ;;  %v1621_v62 = vadd.f32 %v1109_v7, %v277_v32  ;;  %v1118_v27 = vsel %vm3470_vm12, %v1115_v45, %v1112_v37  ;;  %v1141_v10 = vadd.f32 1.0, %v1140_v14  ;;  %v624_v44 = vmul.f32 1.442695, %v477_v42  ;;  %v3574_v36 = vld [vmem:[%s2708_s29 + $0x1d0] sm:$0xff] }
  0xfd   : > { %v2309_v17 = vpop.eup %2308  ;;  %1812 = vst [vmem:[%s2873_s16 + $0x150] sm:$0xff] %v2002_v21  ;;  %v1622_v5 = vadd.f32 %v1118_v27, %v278_v38  ;;  %v1127_v31 = vsel %vm3501_vm13, %v1124_v58, %v1121_v26  ;;  %v1146_v60 = vadd.f32 1.0, %v3524_v22  ;;  %v626_v6 = vmul.f32 1.442695, %v478_v23 }
  0xfe   : > { %v2003_v32 = vadd.f32 -0.6931472, %v1621_v62  ;;  %v1623_v20 = vadd.f32 %v1127_v31, %v279_v2  ;;  %v1130_v43 = vmul.f32 0.6931472, %v2309_v17  ;;  %v628_v30 = vmul.f32 1.442695, %v479_v1 }
  0xff   : > { %v2004_v13 = vadd.f32 -0.6931472, %v1622_v5  ;;  %v282_v11 = vmax.f32 %v3402_v59, 0.0  ;;  %2316 = vlog2.f32 %v1146_v60  ;;  %v630_v38 = vmul.f32 1.442695, %v480_v51 }
 0x100   : > { %1813 = vst [vmem:[%s2873_s16 + $0x158] sm:$0xff] %v2003_v32  ;;  %v2005_v45 = vadd.f32 -0.6931472, %v1623_v20  ;;  %v1136_v12 = vsel %vm3506_vm14, %v1133_v48, %v1130_v43  ;;  %v1142_v34 = vmul.f32 %v3468_v19, %v1141_v10  ;;  %2318 = vpow2.f32 %v624_v44 }
 0x101   : > { %v2311_v25 = vpop.eup %2310  ;;  %1814 = vst [vmem:[%s2873_s16 + $0x160] sm:$0xff] %v2004_v13  ;;  %v1624_v56 = vadd.f32 %v1136_v12, %v280_v47  ;;  %vm3549_vm15 = vcmp.lt.f32.partialorder %v1143_v9, 0.0004427343  ;;  %2320 = vpow2.f32 %v626_v6  ;;  %v385_v58 = vand.u32 2147483647, %v3537_v3  ;;  %v3590_v6 = vld [vmem:[%s2708_s29 + $0x1d8] sm:$0xff] }
 0x102   : > { %1815 = vst [vmem:[%s2873_s16 + $0x168] sm:$0xff] %v2005_v45  ;;  %v1139_v55 = vmul.f32 0.6931472, %v2311_v25  ;;  %v283_v19 = vmax.f32 %v3425_v29, 0.0  ;;  %v284_v18 = vmax.f32 %v3436_v15, 0.0  ;;  %2322 = vpow2.f32 %v628_v30  ;;  %v3606_v25 = vld [vmem:[%s2708_s29 + $0x1e8] sm:$0xff] }
 0x103   : > { %v2313_v46 = vpop.eup %2312  ;;  %v2006_v47 = vadd.f32 -0.6931472, %v1624_v56  ;;  %v1149_v35 = vmul.f32 -0.5, %v3524_v22  ;;  %2324 = vpow2.f32 %v630_v38  ;;  %v481_v0 = vsub.f32 0.0, %v385_v58 }
 0x104   : > { %v2315_v63 = vpop.eup %2314  ;;  %v1145_v49 = vsel %vm3549_vm15, %v1142_v34, %v1139_v55  ;;  %v1155_v52 = vadd.f32 1.0, %v2313_v46  ;;  %v285_v61 = vmax.f32 %v3486_v33, 0.0  ;;  %v386_v4 = vand.u32 2147483647, %v3555_v53 }
 0x105   : > { %1816 = vst [vmem:[%s2873_s16 + $0x170] sm:$0xff] %v2006_v47  ;;  %v1625_v14 = vadd.f32 %v1145_v49, %v281_v8  ;;  %v1158_v16 = vmul.f32 -0.5, %v2313_v46  ;;  %v1164_v40 = vadd.f32 1.0, %v2315_v63  ;;  %v1167_v24 = vmul.f32 -0.5, %v2315_v63 }
 0x106   : > { %2326 = vlog2.f32 %v1155_v52  ;;  %v286_v50 = vmax.f32 %v3492_v57, 0.0  ;;  %v287_v42 = vmax.f32 %v3495_v41, 0.0  ;;  %v632_v23 = vmul.f32 1.442695, %v481_v0 }
 0x107   : > { %v2007_v37 = vadd.f32 -0.6931472, %v1625_v14  ;;  %v1150_v48 = vadd.f32 1.0, %v1149_v35  ;;  %v1152_v9 = vand.u32 2147483647, %v3524_v22  ;;  %2328 = vlog2.f32 %v1164_v40 }
 0x108   : > { %v1161_v39 = vand.u32 2147483647, %v2313_v46  ;;  %2330 = vpow2.f32 %v632_v23  ;;  %v482_v8 = vsub.f32 0.0, %v386_v4  ;;  %v387_v1 = vand.u32 2147483647, %v3569_v54 }
 0x109   : > { %1817 = vst [vmem:[%s2873_s16 + $0x178] sm:$0xff] %v2007_v37  ;;  %v1159_v21 = vadd.f32 1.0, %v1158_v16  ;;  %v1168_v7 = vadd.f32 1.0, %v1167_v24  ;;  %v1170_v26 = vand.u32 2147483647, %v2315_v63  ;;  %v288_v62 = vmax.f32 %v3498_v28, 0.0 }
 0x10a   : > { %v388_v51 = vand.u32 2147483647, %v3574_v36  ;;  %v289_v27 = vmax.f32 %v3537_v3, 0.0  ;;  %v634_v10 = vmul.f32 1.442695, %v482_v8  ;;  %v483_v44 = vsub.f32 0.0, %v387_v1 }
 0x10b   : > { %v1151_v17 = vmul.f32 %v3524_v22, %v1150_v48  ;;  %vm3583_vm0 = vcmp.lt.f32.partialorder %v1152_v9, 0.0004427343  ;;  %v290_v31 = vmax.f32 %v3555_v53, 0.0  ;;  %v291_v60 = vmax.f32 %v3569_v54, 0.0  ;;  %v3597_v22 = vld [vmem:[%s2708_s29 + $0x1e0] sm:$0xff] }
 0x10c   : > { %v2317_v32 = vpop.eup %2316  ;;  %vm3592_vm1 = vcmp.lt.f32.partialorder %v1161_v39, 0.0004427343  ;;  %2332 = vpow2.f32 %v634_v10  ;;  %v636_v43 = vmul.f32 1.442695, %v483_v44  ;;  %v484_v30 = vsub.f32 0.0, %v388_v51 }
 0x10d   : > { %v3599_v13 = vpop.eup %2318  ;;  %v1148_v38 = vmul.f32 0.6931472, %v2317_v32  ;;  %v1160_v45 = vmul.f32 %v2313_v46, %v1159_v21  ;;  %v1169_v12 = vmul.f32 %v2315_v63, %v1168_v7  ;;  %vm3601_vm2 = vcmp.lt.f32.partialorder %v1170_v26, 0.0004427343 }
 0x10e   : > { %v3608_v56 = vpop.eup %2320  ;;  %v1173_v2 = vadd.f32 1.0, %v3599_v13  ;;  %2334 = vpow2.f32 %v636_v43  ;;  %v292_v58 = vmax.f32 %v3574_v36, 0.0  ;;  %v389_v55 = vand.u32 2147483647, %v3590_v6 }
 0x10f   : > { %v3613_v47 = vpop.eup %2322  ;;  %v1154_v46 = vsel %vm3583_vm0, %v1151_v17, %v1148_v38  ;;  %v1182_v35 = vadd.f32 1.0, %v3608_v56  ;;  %v293_v0 = vmax.f32 %v3590_v6, 0.0  ;;  %v390_v63 = vand.u32 2147483647, %v3597_v22 }
 0x110   : > { %v3620_v49 = vpop.eup %2324  ;;  %v1626_v52 = vadd.f32 %v1154_v46, %v282_v11  ;;  %2336 = vlog2.f32 %v1173_v2  ;;  %v638_v4 = vmul.f32 1.442695, %v484_v30  ;;  %v391_v14 = vand.u32 2147483647, %v3606_v25 }
 0x111   : > { %v1176_v16 = vmul.f32 -0.5, %v3599_v13  ;;  %2338 = vlog2.f32 %v1182_v35  ;;  %v1191_v40 = vadd.f32 1.0, %v3613_v47  ;;  %v294_v24 = vmax.f32 %v3597_v22, 0.0 }
 0x112   : > { %v2008_v23 = vadd.f32 -0.6931472, %v1626_v52  ;;  %v1179_v37 = vand.u32 2147483647, %v3599_v13  ;;  %v485_v48 = vsub.f32 0.0, %v389_v55  ;;  %v295_v9 = vmax.f32 %v3606_v25, 0.0 }
 0x113   : > { %v2327_v59 = vpop.eup %2326  ;;  %v1185_v11 = vmul.f32 -0.5, %v3608_v56  ;;  %2340 = vlog2.f32 %v1191_v40  ;;  %v1200_v39 = vadd.f32 1.0, %v3620_v49  ;;  %v486_v8 = vsub.f32 0.0, %v390_v63  ;;  %v3654_v63 = vld [vmem:[%s2708_s29 + $0x1f0] sm:$0xff]  ;;  %v3715_v40 = vld [vmem:[%s2708_s29 + $0x200] sm:$0xff] }
 0x114   : > { %v2329_v1 = vpop.eup %2328  ;;  %1818 = vst [vmem:[%s2873_s16 + $0x180] sm:$0xff] %v2008_v23  ;;  %v1157_v21 = vmul.f32 0.6931472, %v2327_v59  ;;  %v1194_v7 = vmul.f32 -0.5, %v3613_v47  ;;  %2342 = vpow2.f32 %v638_v4  ;;  %v487_v26 = vsub.f32 0.0, %v391_v14 }
 0x115   : > { %v3634_v51 = vpop.eup %2330  ;;  %v1166_v10 = vmul.f32 0.6931472, %v2329_v1  ;;  %v1177_v44 = vadd.f32 1.0, %v1176_v16  ;;  %v1188_v17 = vand.u32 2147483647, %v3608_v56  ;;  %2344 = vlog2.f32 %v1200_v39  ;;  %v3678_v1 = vld [vmem:[%s2708_s29 + $0x1f8] sm:$0xff] }
 0x116   : > { %v1163_v5 = vsel %vm3592_vm1, %v1160_v45, %v1157_v21  ;;  %vm3639_vm3 = vcmp.lt.f32.partialorder %v1179_v37, 0.0004427343  ;;  %v1203_v43 = vmul.f32 -0.5, %v3620_v49  ;;  %v1209_v30 = vadd.f32 1.0, %v3634_v51 }
 0x117   : > { %v1627_v38 = vadd.f32 %v1163_v5, %v283_v19  ;;  %v1172_v2 = vsel %vm3601_vm2, %v1169_v12, %v1166_v10  ;;  %v1186_v55 = vadd.f32 1.0, %v1185_v11  ;;  %v1197_v46 = vand.u32 2147483647, %v3613_v47 }
 0x118   : > { %v1628_v20 = vadd.f32 %v1172_v2, %v284_v18  ;;  %v1195_v45 = vadd.f32 1.0, %v1194_v7  ;;  %2346 = vlog2.f32 %v1209_v30  ;;  %v1212_v35 = vmul.f32 -0.5, %v3634_v51 }
 0x119   : > { %v3656_v52 = vpop.eup %2332  ;;  %v2009_v29 = vadd.f32 -0.6931472, %v1627_v38  ;;  %v640_v19 = vmul.f32 1.442695, %v485_v48  ;;  %v642_v34 = vmul.f32 1.442695, %v486_v8  ;;  %v1178_v18 = vmul.f32 %v3599_v13, %v1177_v44 }
 0x11a   : > { %v2010_v12 = vadd.f32 -0.6931472, %v1628_v20  ;;  %v1204_v4 = vadd.f32 1.0, %v1203_v43  ;;  %v1206_v14 = vand.u32 2147483647, %v3620_v49  ;;  %v1218_v16 = vadd.f32 1.0, %v3656_v52 }
 0x11b   : > { %v3660_v15 = vpop.eup %2334  ;;  %1819 = vst [vmem:[%s2873_s16 + $0x188] sm:$0xff] %v2009_v29  ;;  %vm3664_vm4 = vcmp.lt.f32.partialorder %v1188_v17, 0.0004427343  ;;  %2348 = vpow2.f32 %v640_v19  ;;  %v644_v23 = vmul.f32 1.442695, %v487_v26  ;;  %v1187_v37 = vmul.f32 %v3608_v56, %v1186_v55 }
 0x11c   : > { %1820 = vst [vmem:[%s2873_s16 + $0x190] sm:$0xff] %v2010_v12  ;;  %v1213_v48 = vadd.f32 1.0, %v1212_v35  ;;  %2350 = vlog2.f32 %v1218_v16  ;;  %v1227_v59 = vadd.f32 1.0, %v3660_v15  ;;  %v1196_v39 = vmul.f32 %v3613_v47, %v1195_v45 }
 0x11d   : > { %v2337_v11 = vpop.eup %2336  ;;  %vm3672_vm5 = vcmp.lt.f32.partialorder %v1197_v46, 0.0004427343  ;;  %2352 = vpow2.f32 %v642_v34  ;;  %v392_v13 = vand.u32 2147483647, %v3654_v63  ;;  %v1205_v56 = vmul.f32 %v3620_v49, %v1204_v4 }
 0x11e   : > { %v2339_v21 = vpop.eup %2338  ;;  %v1175_v7 = vmul.f32 0.6931472, %v2337_v11  ;;  %vm3681_vm6 = vcmp.lt.f32.partialorder %v1206_v14, 0.0004427343  ;;  %2354 = vlog2.f32 %v1227_v59  ;;  %v1215_v47 = vand.u32 2147483647, %v3634_v51 }
 0x11f   : > { %v1184_v10 = vmul.f32 0.6931472, %v2339_v21  ;;  %2356 = vpow2.f32 %v644_v23  ;;  %v488_v44 = vsub.f32 0.0, %v392_v13  ;;  %v1214_v43 = vmul.f32 %v3634_v51, %v1213_v48  ;;  %v3721_v48 = vld [vmem:[%s2708_s29 + $0x208] sm:$0xff] }
 0x120   : > { %v2341_v17 = vpop.eup %2340  ;;  %v1181_v5 = vsel %vm3639_vm3, %v1178_v18, %v1175_v7  ;;  %v1221_v30 = vmul.f32 -0.5, %v3656_v52  ;;  %v393_v49 = vand.u32 2147483647, %v3678_v1  ;;  %v1224_v51 = vand.u32 2147483647, %v3656_v52 }
 0x121   : > { %v3691_v38 = vpop.eup %2342  ;;  %v1629_v2 = vadd.f32 %v1181_v5, %v285_v61  ;;  %v1190_v55 = vsel %vm3664_vm4, %v1187_v37, %v1184_v10  ;;  %v1193_v46 = vmul.f32 0.6931472, %v2341_v17  ;;  %v646_v20 = vmul.f32 1.442695, %v488_v44 }
 0x122   : > { %v2345_v45 = vpop.eup %2344  ;;  %v1630_v32 = vadd.f32 %v1190_v55, %v286_v50  ;;  %v1230_v35 = vmul.f32 -0.5, %v3660_v15  ;;  %v1236_v29 = vadd.f32 1.0, %v3691_v38  ;;  %v1222_v50 = vadd.f32 1.0, %v1221_v30 }
 0x123   : > { %v2011_v33 = vadd.f32 -0.6931472, %v1629_v2  ;;  %v1199_v61 = vsel %vm3672_vm5, %v1196_v39, %v1193_v46  ;;  %v1202_v19 = vmul.f32 0.6931472, %v2345_v45  ;;  %2358 = vpow2.f32 %v646_v20 }
 0x124   : > { %v2012_v34 = vadd.f32 -0.6931472, %v1630_v32  ;;  %v1631_v57 = vadd.f32 %v1199_v61, %v287_v42  ;;  %2360 = vlog2.f32 %v1236_v29  ;;  %vm3709_vm7 = vcmp.lt.f32.partialorder %v1215_v47, 0.0004427343  ;;  %v3765_v29 = vld [vmem:[%s2708_s29 + $0x210] sm:$0xff] }
 0x125   : > { %v2347_v12 = vpop.eup %2346  ;;  %1821 = vst [vmem:[%s2873_s16 + $0x198] sm:$0xff] %v2011_v33  ;;  %v1208_v4 = vsel %vm3681_vm6, %v1205_v56, %v1202_v19  ;;  %v1233_v16 = vand.u32 2147483647, %v3660_v15  ;;  %v489_v18 = vsub.f32 0.0, %v393_v49  ;;  %v1231_v37 = vadd.f32 1.0, %v1230_v35 }
 0x126   : > { %1822 = vst [vmem:[%s2873_s16 + $0x1a0] sm:$0xff] %v2012_v34  ;;  %v2013_v41 = vadd.f32 -0.6931472, %v1631_v57  ;;  %v1632_v42 = vadd.f32 %v1208_v4, %v288_v62  ;;  %v1211_v23 = vmul.f32 0.6931472, %v2347_v12  ;;  %v1239_v11 = vmul.f32 -0.5, %v3691_v38 }
 0x127   : > { %vm3723_vm8 = vcmp.lt.f32.partialorder %v1224_v51, 0.0004427343  ;;  %v296_v39 = vmax.f32 %v3654_v63, 0.0  ;;  %v648_v8 = vmul.f32 1.442695, %v489_v18  ;;  %v1223_v62 = vmul.f32 %v3656_v52, %v1222_v50 }
 0x128   : > { %v3729_v13 = vpop.eup %2348  ;;  %1823 = vst [vmem:[%s2873_s16 + $0x1a8] sm:$0xff] %v2013_v41  ;;  %v2014_v21 = vadd.f32 -0.6931472, %v1632_v42  ;;  %v1217_v28 = vsel %vm3709_vm7, %v1214_v43, %v1211_v23  ;;  %v394_v7 = vand.u32 2147483647, %v3715_v40  ;;  %v1232_v52 = vmul.f32 %v3660_v15, %v1231_v37  ;;  %v3782_v42 = vld [vmem:[%s2708_s29 + $0x218] sm:$0xff] }
 0x129   : > { %v2351_v56 = vpop.eup %2350  ;;  %v1633_v26 = vadd.f32 %v1217_v28, %v289_v27  ;;  %vm3738_vm9 = vcmp.lt.f32.partialorder %v1233_v16, 0.0004427343  ;;  %v1242_v47 = vand.u32 2147483647, %v3691_v38  ;;  %v1245_v44 = vadd.f32 1.0, %v3729_v13 }
 0x12a   : > { %v3744_v17 = vpop.eup %2352  ;;  %1824 = vst [vmem:[%s2873_s16 + $0x1b0] sm:$0xff] %v2014_v21  ;;  %v1220_v5 = vmul.f32 0.6931472, %v2351_v56  ;;  %2362 = vpow2.f32 %v648_v8  ;;  %v395_v43 = vand.u32 2147483647, %v3721_v48  ;;  %v1240_v30 = vadd.f32 1.0, %v1239_v11 }
 0x12b   : > { %v2355_v3 = vpop.eup %2354  ;;  %v2015_v27 = vadd.f32 -0.6931472, %v1633_v26  ;;  %2364 = vlog2.f32 %v1245_v44  ;;  %v297_v49 = vmax.f32 %v3678_v1, 0.0  ;;  %v1254_v20 = vadd.f32 1.0, %v3744_v17  ;;  %v3792_v21 = vld [vmem:[%s2708_s29 + $0x220] sm:$0xff]  ;;  %v3798_v26 = vld [vmem:[%s2708_s29 + $0x228] sm:$0xff] }
 0x12c   : > { %v3750_v2 = vpop.eup %2356  ;;  %v1226_v55 = vsel %vm3723_vm8, %v1223_v62, %v1220_v5  ;;  %v1229_v46 = vmul.f32 0.6931472, %v2355_v3  ;;  %v490_v45 = vsub.f32 0.0, %v394_v7  ;;  %vm3758_vm10 = vcmp.lt.f32.partialorder %v1242_v47, 0.0004427343  ;;  %v3805_v5 = vld [vmem:[%s2708_s29 + $0x230] sm:$0xff] }
 0x12d   : > { %1825 = vst [vmem:[%s2873_s16 + $0x1b8] sm:$0xff] %v2015_v27  ;;  %v1634_v15 = vadd.f32 %v1226_v55, %v290_v31  ;;  %v1248_v51 = vmul.f32 -0.5, %v3729_v13  ;;  %v1263_v35 = vadd.f32 1.0, %v3750_v2  ;;  %v1251_v61 = vand.u32 2147483647, %v3729_v13 }
 0x12e   : > { %v1235_v33 = vsel %vm3738_vm9, %v1232_v52, %v1229_v46  ;;  %2366 = vlog2.f32 %v1254_v20  ;;  %v491_v19 = vsub.f32 0.0, %v395_v43  ;;  %v1257_v34 = vmul.f32 -0.5, %v3744_v17 }
 0x12f   : > { %v2016_v53 = vadd.f32 -0.6931472, %v1634_v15  ;;  %v1635_v31 = vadd.f32 %v1235_v33, %v291_v60  ;;  %2368 = vlog2.f32 %v1263_v35  ;;  %v1241_v50 = vmul.f32 %v3691_v38, %v1240_v30  ;;  %v3840_v38 = vld [vmem:[%s2708_s29 + $0x240] sm:$0xff]  ;;  %v3875_v33 = vld [vmem:[%s2708_s29 + $0x248] sm:$0xff] }
 0x130   : > { %v3773_v57 = vpop.eup %2358  ;;  %v1266_v12 = vmul.f32 -0.5, %v3750_v2  ;;  %v650_v4 = vmul.f32 1.442695, %v490_v45  ;;  %v396_v14 = vand.u32 2147483647, %v3765_v29  ;;  %v1249_v41 = vadd.f32 1.0, %v1248_v51 }
 0x131   : > { %v2361_v16 = vpop.eup %2360  ;;  %1826 = vst [vmem:[%s2873_s16 + $0x1c0] sm:$0xff] %v2016_v53  ;;  %v2017_v18 = vadd.f32 -0.6931472, %v1635_v31  ;;  %v1272_v54 = vadd.f32 1.0, %v3773_v57  ;;  %v298_v60 = vmax.f32 %v3715_v40, 0.0  ;;  %v299_v37 = vmax.f32 %v3721_v48, 0.0 }
 0x132   : > { %v1238_v23 = vmul.f32 0.6931472, %v2361_v16  ;;  %vm3784_vm11 = vcmp.lt.f32.partialorder %v1251_v61, 0.0004427343  ;;  %2370 = vpow2.f32 %v650_v4  ;;  %v1258_v59 = vadd.f32 1.0, %v1257_v34 }
 0x133   : > { %1827 = vst [vmem:[%s2873_s16 + $0x1c8] sm:$0xff] %v2017_v18  ;;  %v1260_v11 = vand.u32 2147483647, %v3744_v17  ;;  %2372 = vlog2.f32 %v1272_v54  ;;  %v652_v8 = vmul.f32 1.442695, %v491_v19  ;;  %v1267_v62 = vadd.f32 1.0, %v1266_v12 }
 0x134   : > { %v1244_v28 = vsel %vm3758_vm10, %v1241_v50, %v1238_v23  ;;  %v492_v7 = vsub.f32 0.0, %v396_v14  ;;  %v397_v56 = vand.u32 2147483647, %v3782_v42  ;;  %v1250_v47 = vmul.f32 %v3729_v13, %v1249_v41 }
 0x135   : > { %v1636_v10 = vadd.f32 %v1244_v28, %v292_v58  ;;  %v1269_v44 = vand.u32 2147483647, %v3750_v2  ;;  %2374 = vpow2.f32 %v652_v8  ;;  %v1275_v52 = vmul.f32 -0.5, %v3773_v57 }
 0x136   : > { %v654_v43 = vmul.f32 1.442695, %v492_v7  ;;  %v493_v3 = vsub.f32 0.0, %v397_v56  ;;  %v398_v27 = vand.u32 2147483647, %v3792_v21  ;;  %v1259_v36 = vmul.f32 %v3744_v17, %v1258_v59 }
 0x137   : > { %v3809_v30 = vpop.eup %2362  ;;  %v2018_v55 = vadd.f32 -0.6931472, %v1636_v10  ;;  %vm3812_vm12 = vcmp.lt.f32.partialorder %v1260_v11, 0.0004427343  ;;  %v399_v13 = vand.u32 2147483647, %v3798_v26  ;;  %v1268_v20 = vmul.f32 %v3750_v2, %v1267_v62 }
 0x138   : > { %v2365_v46 = vpop.eup %2364  ;;  %v1278_v45 = vand.u32 2147483647, %v3773_v57  ;;  %v1281_v15 = vadd.f32 1.0, %v3809_v30  ;;  %2376 = vpow2.f32 %v654_v43  ;;  %v656_v51 = vmul.f32 1.442695, %v493_v3  ;;  %v3827_v2 = vld [vmem:[%s2708_s29 + $0x238] sm:$0xff] }
 0x139   : > { %1828 = vst [vmem:[%s2873_s16 + $0x1d0] sm:$0xff] %v2018_v55  ;;  %v1247_v32 = vmul.f32 0.6931472, %v2365_v46  ;;  %v494_v35 = vsub.f32 0.0, %v398_v27  ;;  %v495_v17 = vsub.f32 0.0, %v399_v13  ;;  %v1276_v61 = vadd.f32 1.0, %v1275_v52 }
 0x13a   : > { %vm3821_vm13 = vcmp.lt.f32.partialorder %v1269_v44, 0.0004427343  ;;  %2378 = vlog2.f32 %v1281_v15  ;;  %v400_v19 = vand.u32 2147483647, %v3805_v5  ;;  %vm3833_vm14 = vcmp.lt.f32.partialorder %v1278_v45, 0.0004427343 }
 0x13b   : > { %v2367_v53 = vpop.eup %2366  ;;  %v1253_v31 = vsel %vm3784_vm11, %v1250_v47, %v1247_v32  ;;  %2380 = vpow2.f32 %v656_v51  ;;  %v658_v34 = vmul.f32 1.442695, %v494_v35  ;;  %v660_v50 = vmul.f32 1.442695, %v495_v17 }
 0x13c   : > { %v2369_v12 = vpop.eup %2368  ;;  %v1637_v4 = vadd.f32 %v1253_v31, %v293_v0  ;;  %v1256_v14 = vmul.f32 0.6931472, %v2367_v53  ;;  %v496_v18 = vsub.f32 0.0, %v400_v19  ;;  %v1284_v54 = vmul.f32 -0.5, %v3809_v30 }
 0x13d   : > { %v1265_v41 = vmul.f32 0.6931472, %v2369_v12  ;;  %2382 = vpow2.f32 %v658_v34  ;;  %v401_v23 = vand.u32 2147483647, %v3827_v2  ;;  %v1277_v62 = vmul.f32 %v3773_v57, %v1276_v61 }
 0x13e   : > { %v2019_v59 = vadd.f32 -0.6931472, %v1637_v4  ;;  %v1262_v6 = vsel %vm3812_vm12, %v1259_v36, %v1256_v14  ;;  %2384 = vpow2.f32 %v660_v50  ;;  %v662_v0 = vmul.f32 1.442695, %v496_v18 }
 0x13f   : > { %v3844_v11 = vpop.eup %2370  ;;  %v1638_v8 = vadd.f32 %v1262_v6, %v294_v24  ;;  %v1271_v28 = vsel %vm3821_vm13, %v1268_v20, %v1265_v41  ;;  %v497_v7 = vsub.f32 0.0, %v401_v23  ;;  %v1287_v47 = vand.u32 2147483647, %v3809_v30  ;;  %v3881_v41 = vld [vmem:[%s2708_s29 + $0x250] sm:$0xff] }
 0x140   : > { %v2373_v56 = vpop.eup %2372  ;;  %1829 = vst [vmem:[%s2873_s16 + $0x1d8] sm:$0xff] %v2019_v59  ;;  %v1639_v10 = vadd.f32 %v1271_v28, %v295_v9  ;;  %v1290_v44 = vadd.f32 1.0, %v3844_v11  ;;  %v402_v22 = vand.u32 2147483647, %v3840_v38  ;;  %2386 = vpow2.f32 %v662_v0 }
 0x141   : > { %v2020_v24 = vadd.f32 -0.6931472, %v1638_v8  ;;  %v1274_v52 = vmul.f32 0.6931472, %v2373_v56  ;;  %v664_v43 = vmul.f32 1.442695, %v497_v7 }
 0x142   : > { %v2375_v3 = vpop.eup %2374  ;;  %v2021_v57 = vadd.f32 -0.6931472, %v1639_v10  ;;  %v1285_v27 = vadd.f32 1.0, %v1284_v54  ;;  %2388 = vlog2.f32 %v1290_v44  ;;  %v300_v55 = vmax.f32 %v3765_v29, 0.0 }
 0x143   : > { %1830 = vst [vmem:[%s2873_s16 + $0x1e0] sm:$0xff] %v2020_v24  ;;  %v1280_v25 = vsel %vm3833_vm14, %v1277_v62, %v1274_v52  ;;  %v1293_v9 = vmul.f32 -0.5, %v3844_v11  ;;  %v1299_v36 = vadd.f32 1.0, %v2375_v3  ;;  %v301_v58 = vmax.f32 %v3782_v42, 0.0 }
 0x144   : > { %1831 = vst [vmem:[%s2873_s16 + $0x1e8] sm:$0xff] %v2021_v57  ;;  %v1640_v13 = vadd.f32 %v1280_v25, %v296_v39  ;;  %v302_v46 = vmax.f32 %v3792_v21, 0.0  ;;  %2390 = vpow2.f32 %v664_v43  ;;  %v498_v20 = vsub.f32 0.0, %v402_v22 }
 0x145   : > { %v2377_v45 = vpop.eup %2376  ;;  %vm3867_vm15 = vcmp.lt.f32.partialorder %v1287_v47, 0.0004427343  ;;  %2392 = vlog2.f32 %v1299_v36  ;;  %v1302_v32 = vmul.f32 -0.5, %v2375_v3  ;;  %v303_v51 = vmax.f32 %v3798_v26, 0.0 }
 0x146   : > { %v2022_v35 = vadd.f32 -0.6931472, %v1640_v13  ;;  %v1286_v17 = vmul.f32 %v3809_v30, %v1285_v27  ;;  %v1296_v63 = vand.u32 2147483647, %v3844_v11  ;;  %v1308_v39 = vadd.f32 1.0, %v2377_v45 }
 0x147   : > { %v2379_v61 = vpop.eup %2378  ;;  %v1294_v19 = vadd.f32 1.0, %v1293_v9  ;;  %v1305_v53 = vand.u32 2147483647, %v2375_v3  ;;  %v304_v31 = vmax.f32 %v3805_v5, 0.0  ;;  %v666_v34 = vmul.f32 1.442695, %v498_v20 }
 0x148   : > { %v2381_v50 = vpop.eup %2380  ;;  %1832 = vst [vmem:[%s2873_s16 + $0x1f0] sm:$0xff] %v2022_v35  ;;  %v1283_v12 = vmul.f32 0.6931472, %v2379_v61  ;;  %2394 = vlog2.f32 %v1308_v39  ;;  %v1311_v4 = vmul.f32 -0.5, %v2377_v45  ;;  %v305_v14 = vmax.f32 %v3827_v2, 0.0  ;;  %v3919_v39 = vld [vmem:[%s2708_s29 + $0x258] sm:$0xff] }
 0x149   : > { %v1303_v30 = vadd.f32 1.0, %v1302_v32  ;;  %v1317_v16 = vadd.f32 1.0, %v2381_v50  ;;  %v1320_v18 = vmul.f32 -0.5, %v2381_v50  ;;  %2396 = vpow2.f32 %v666_v34 }
 0x14a   : > { %v3883_v54 = vpop.eup %2382  ;;  %v1289_v23 = vsel %vm3867_vm15, %v1286_v17, %v1283_v12  ;;  %vm3887_vm0 = vcmp.lt.f32.partialorder %v1296_v63, 0.0004427343  ;;  %v1314_v6 = vand.u32 2147483647, %v2377_v45  ;;  %v403_v0 = vand.u32 2147483647, %v3875_v33 }
 0x14b   : > { %v2385_v8 = vpop.eup %2384  ;;  %v1641_v28 = vadd.f32 %v1289_v23, %v297_v49  ;;  %v1295_v62 = vmul.f32 %v3844_v11, %v1294_v19  ;;  %vm3895_vm1 = vcmp.lt.f32.partialorder %v1305_v53, 0.0004427343  ;;  %2398 = vlog2.f32 %v1317_v16 }
 0x14c   : > { %v1312_v56 = vadd.f32 1.0, %v1311_v4  ;;  %v1323_v10 = vand.u32 2147483647, %v2381_v50  ;;  %v1326_v47 = vadd.f32 1.0, %v3883_v54  ;;  %v1335_v44 = vadd.f32 1.0, %v2385_v8 }
 0x14d   : > { %v2023_v22 = vadd.f32 -0.6931472, %v1641_v28  ;;  %v1304_v24 = vmul.f32 %v2375_v3, %v1303_v30  ;;  %v1321_v52 = vadd.f32 1.0, %v1320_v18  ;;  %v404_v43 = vand.u32 2147483647, %v3881_v41  ;;  %v3901_v1 = vpop.eup %2386 }
 0x14e   : > { %vm3903_vm2 = vcmp.lt.f32.partialorder %v1314_v6, 0.0004427343  ;;  %2400 = vlog2.f32 %v1326_v47  ;;  %v1329_v11 = vmul.f32 -0.5, %v3883_v54  ;;  %v499_v57 = vsub.f32 0.0, %v403_v0 }
 0x14f   : > { %v2389_v27 = vpop.eup %2388  ;;  %1833 = vst [vmem:[%s2873_s16 + $0x1f8] sm:$0xff] %v2023_v22  ;;  %v1332_v25 = vand.u32 2147483647, %v3883_v54  ;;  %2402 = vlog2.f32 %v1335_v44  ;;  %v1338_v3 = vmul.f32 -0.5, %v2385_v8  ;;  %v1344_v9 = vadd.f32 1.0, %v3901_v1 }
 0x150   : > { %v1292_v36 = vmul.f32 0.6931472, %v2389_v27  ;;  %v1313_v13 = vmul.f32 %v2377_v45, %v1312_v56  ;;  %vm3911_vm3 = vcmp.lt.f32.partialorder %v1323_v10, 0.0004427343  ;;  %v1341_v15 = vand.u32 2147483647, %v2385_v8 }
 0x151   : > { %v3915_v32 = vpop.eup %2390  ;;  %v1322_v35 = vmul.f32 %v2381_v50, %v1321_v52  ;;  %2404 = vlog2.f32 %v1344_v9  ;;  %v1347_v17 = vmul.f32 -0.5, %v3901_v1  ;;  %v500_v63 = vsub.f32 0.0, %v404_v43  ;;  %v3948_v52 = vld [vmem:[%s2708_s29 + $0x260] sm:$0xff]  ;;  %v3965_v9 = vld [vmem:[%s2708_s29 + $0x270] sm:$0xff] }
 0x152   : > { %v2393_v61 = vpop.eup %2392  ;;  %v1298_v19 = vsel %vm3887_vm0, %v1295_v62, %v1292_v36  ;;  %v1330_v53 = vadd.f32 1.0, %v1329_v11  ;;  %v1353_v45 = vadd.f32 1.0, %v3915_v32  ;;  %v668_v34 = vmul.f32 1.442695, %v499_v57 }
 0x153   : > { %v1642_v12 = vadd.f32 %v1298_v19, %v298_v60  ;;  %v1301_v4 = vmul.f32 0.6931472, %v2393_v61  ;;  %vm3926_vm4 = vcmp.lt.f32.partialorder %v1332_v25, 0.0004427343  ;;  %v1339_v30 = vadd.f32 1.0, %v1338_v3 }
 0x154   : > { %vm3930_vm5 = vcmp.lt.f32.partialorder %v1341_v15, 0.0004427343  ;;  %v1350_v18 = vand.u32 2147483647, %v3901_v1  ;;  %2406 = vlog2.f32 %v1353_v45  ;;  %v670_v23 = vmul.f32 1.442695, %v500_v63 }
 0x155   : > { %v405_v59 = vand.u32 2147483647, %v3919_v39  ;;  %v2395_v40 = vpop.eup %2394  ;;  %v2024_v60 = vadd.f32 -0.6931472, %v1642_v12  ;;  %v1307_v6 = vsel %vm3895_vm1, %v1304_v24, %v1301_v4  ;;  %v1348_v0 = vadd.f32 1.0, %v1347_v17 }
 0x156   : > { %v1356_v28 = vmul.f32 -0.5, %v3915_v32  ;;  %v3939_v62 = vpop.eup %2396  ;;  %v1643_v56 = vadd.f32 %v1307_v6, %v299_v37  ;;  %v1310_v10 = vmul.f32 0.6931472, %v2395_v40  ;;  %2408 = vpow2.f32 %v668_v34  ;;  %v3995_v6 = vld [vmem:[%s2708_s29 + $0x280] sm:$0xff] }
 0x157   : > { %v501_v47 = vsub.f32 0.0, %v405_v59  ;;  %1834 = vst [vmem:[%s2873_s16 + $0x200] sm:$0xff] %v2024_v60  ;;  %v1331_v44 = vmul.f32 %v3883_v54, %v1330_v53  ;;  %v1340_v22 = vmul.f32 %v2385_v8, %v1339_v30  ;;  %v1359_v7 = vand.u32 2147483647, %v3915_v32  ;;  %v3955_v8 = vld [vmem:[%s2708_s29 + $0x268] sm:$0xff]  ;;  %v3978_v53 = vld [vmem:[%s2708_s29 + $0x278] sm:$0xff] }
 0x158   : > { %v1362_v24 = vadd.f32 1.0, %v3939_v62  ;;  %v2399_v43 = vpop.eup %2398  ;;  %v2025_v11 = vadd.f32 -0.6931472, %v1643_v56  ;;  %v1316_v48 = vsel %vm3903_vm2, %v1313_v13, %v1310_v10  ;;  %2410 = vpow2.f32 %v670_v23 }
 0x159   : > { %v672_v37 = vmul.f32 1.442695, %v501_v47  ;;  %v1644_v57 = vadd.f32 %v1316_v48, %v300_v55  ;;  %v1319_v27 = vmul.f32 0.6931472, %v2399_v43  ;;  %v1357_v54 = vadd.f32 1.0, %v1356_v28 }
 0x15a   : > { %2412 = vlog2.f32 %v1362_v24  ;;  %1835 = vst [vmem:[%s2873_s16 + $0x208] sm:$0xff] %v2025_v11  ;;  %v1349_v25 = vmul.f32 %v3901_v1, %v1348_v0  ;;  %vm3959_vm6 = vcmp.lt.f32.partialorder %v1350_v18, 0.0004427343  ;;  %v406_v49 = vand.u32 2147483647, %v3948_v52 }
 0x15b   : > { %2414 = vpow2.f32 %v672_v37  ;;  %v2401_v29 = vpop.eup %2400  ;;  %v2026_v55 = vadd.f32 -0.6931472, %v1644_v57  ;;  %v1325_v36 = vsel %vm3911_vm3, %v1322_v35, %v1319_v27  ;;  %vm3969_vm7 = vcmp.lt.f32.partialorder %v1359_v7, 0.0004427343 }
 0x15c   : > { %v1365_v1 = vmul.f32 -0.5, %v3939_v62  ;;  %v2403_v15 = vpop.eup %2402  ;;  %v1645_v17 = vadd.f32 %v1325_v36, %v301_v58  ;;  %v1328_v63 = vmul.f32 0.6931472, %v2401_v29  ;;  %v502_v61 = vsub.f32 0.0, %v406_v49  ;;  %v4034_v36 = vld [vmem:[%s2708_s29 + $0x290] sm:$0xff] }
 0x15d   : > { %v407_v19 = vand.u32 2147483647, %v3955_v8  ;;  %1836 = vst [vmem:[%s2873_s16 + $0x210] sm:$0xff] %v2026_v55  ;;  %v1337_v20 = vmul.f32 0.6931472, %v2403_v15  ;;  %v1358_v35 = vmul.f32 %v3915_v32, %v1357_v54  ;;  %v308_v49 = vmax.f32 %v3881_v41, 0.0 }
 0x15e   : > { %v1368_v45 = vand.u32 2147483647, %v3939_v62  ;;  %v408_v34 = vand.u32 2147483647, %v3965_v9  ;;  %v2405_v12 = vpop.eup %2404  ;;  %v2027_v4 = vadd.f32 -0.6931472, %v1645_v17  ;;  %v1334_v42 = vsel %vm3926_vm4, %v1331_v44, %v1328_v63 }
 0x15f   : > { %v674_v58 = vmul.f32 1.442695, %v502_v61  ;;  %v503_v30 = vsub.f32 0.0, %v407_v19  ;;  %v1646_v18 = vadd.f32 %v1334_v42, %v302_v46  ;;  %v1343_v23 = vsel %vm3930_vm5, %v1340_v22, %v1337_v20  ;;  %v4039_v63 = vld [vmem:[%s2708_s29 + $0x298] sm:$0xff] }
 0x160   : > { %v1346_v59 = vmul.f32 0.6931472, %v2405_v12  ;;  %v504_v32 = vsub.f32 0.0, %v408_v34  ;;  %1837 = vst [vmem:[%s2873_s16 + $0x218] sm:$0xff] %v2027_v4  ;;  %v1647_v40 = vadd.f32 %v1343_v23, %v303_v51  ;;  %v409_v50 = vand.u32 2147483647, %v3978_v53 }
 0x161   : > { %2416 = vpow2.f32 %v674_v58  ;;  %v676_v60 = vmul.f32 1.442695, %v503_v30  ;;  %v2407_v0 = vpop.eup %2406  ;;  %v2028_v21 = vadd.f32 -0.6931472, %v1646_v18  ;;  %v1366_v16 = vadd.f32 1.0, %v1365_v1 }
 0x162   : > { %v1352_v46 = vsel %vm3959_vm6, %v1349_v25, %v1346_v59  ;;  %v678_v28 = vmul.f32 1.442695, %v504_v32  ;;  %v2029_v56 = vadd.f32 -0.6931472, %v1647_v40  ;;  %v1355_v10 = vmul.f32 0.6931472, %v2407_v0 }
 0x163   : > { %v1648_v26 = vadd.f32 %v1352_v46, %v304_v31  ;;  %2418 = vpow2.f32 %v676_v60  ;;  %v4001_v51 = vpop.eup %2408  ;;  %1838 = vst [vmem:[%s2873_s16 + $0x220] sm:$0xff] %v2028_v21  ;;  %v505_v47 = vsub.f32 0.0, %v409_v50  ;;  %v410_v44 = vand.u32 2147483647, %v3995_v6  ;;  %v4025_v25 = vld [vmem:[%s2708_s29 + $0x288] sm:$0xff] }
 0x164   : > { %2420 = vpow2.f32 %v678_v28  ;;  %1839 = vst [vmem:[%s2873_s16 + $0x228] sm:$0xff] %v2029_v56  ;;  %v1361_v7 = vsel %vm3969_vm7, %v1358_v35, %v1355_v10  ;;  %v1371_v24 = vadd.f32 1.0, %v4001_v51  ;;  %v306_v31 = vmax.f32 %v3840_v38, 0.0 }
 0x165   : > { %v2030_v22 = vadd.f32 -0.6931472, %v1648_v26  ;;  %v4009_v43 = vpop.eup %2410  ;;  %v1649_v5 = vadd.f32 %v1361_v7, %v305_v14  ;;  %v1367_v11 = vmul.f32 %v3939_v62, %v1366_v16  ;;  %v680_v48 = vmul.f32 1.442695, %v505_v47  ;;  %v4059_v26 = vld [vmem:[%s2708_s29 + $0x2a0] sm:$0xff] }
 0x166   : > { %vm4016_vm8 = vcmp.lt.f32.partialorder %v1368_v45, 0.0004427343  ;;  %2422 = vlog2.f32 %v1371_v24  ;;  %v1380_v27 = vadd.f32 1.0, %v4009_v43  ;;  %v506_v54 = vsub.f32 0.0, %v410_v44 }
 0x167   : > { %v2413_v37 = vpop.eup %2412  ;;  %1840 = vst [vmem:[%s2873_s16 + $0x230] sm:$0xff] %v2030_v22  ;;  %v2031_v14 = vadd.f32 -0.6931472, %v1649_v5  ;;  %2424 = vpow2.f32 %v680_v48  ;;  %v307_v62 = vmax.f32 %v3875_v33, 0.0  ;;  %v309_v29 = vmax.f32 %v3919_v39, 0.0 }
 0x168   : > { %v4021_v2 = vpop.eup %2414  ;;  %v1364_v38 = vmul.f32 0.6931472, %v2413_v37  ;;  %2426 = vlog2.f32 %v1380_v27  ;;  %v1374_v1 = vmul.f32 -0.5, %v4001_v51  ;;  %v1383_v15 = vmul.f32 -0.5, %v4009_v43 }
 0x169   : > { %1841 = vst [vmem:[%s2873_s16 + $0x238] sm:$0xff] %v2031_v14  ;;  %v1389_v55 = vadd.f32 1.0, %v4021_v2  ;;  %v682_v17 = vmul.f32 1.442695, %v506_v54  ;;  %v310_v61 = vmax.f32 %v3948_v52, 0.0  ;;  %v311_v19 = vmax.f32 %v3955_v8, 0.0 }
 0x16a   : > { %v1370_v3 = vsel %vm4016_vm8, %v1367_v11, %v1364_v38  ;;  %v411_v20 = vand.u32 2147483647, %v4025_v25  ;;  %v312_v45 = vmax.f32 %v3965_v9, 0.0  ;;  %v412_v34 = vand.u32 2147483647, %v4034_v36 }
 0x16b   : > { %v1650_v13 = vadd.f32 %v1370_v3, %v306_v31  ;;  %2428 = vlog2.f32 %v1389_v55  ;;  %v1377_v4 = vand.u32 2147483647, %v4001_v51  ;;  %v1392_v42 = vmul.f32 -0.5, %v4021_v2 }
 0x16c   : > { %2430 = vpow2.f32 %v682_v17  ;;  %v507_v58 = vsub.f32 0.0, %v411_v20  ;;  %v413_v30 = vand.u32 2147483647, %v4039_v63  ;;  %v1375_v18 = vadd.f32 1.0, %v1374_v1 }
 0x16d   : > { %v2032_v35 = vadd.f32 -0.6931472, %v1650_v13  ;;  %v1384_v23 = vadd.f32 1.0, %v1383_v15  ;;  %v508_v32 = vsub.f32 0.0, %v412_v34  ;;  %v1386_v60 = vand.u32 2147483647, %v4009_v43 }
 0x16e   : > { %v2417_v12 = vpop.eup %2416  ;;  %v1395_v50 = vand.u32 2147483647, %v4021_v2  ;;  %v313_v21 = vmax.f32 %v3978_v53, 0.0  ;;  %v684_v28 = vmul.f32 1.442695, %v507_v58  ;;  %v509_v56 = vsub.f32 0.0, %v413_v30 }
 0x16f   : > { %1842 = vst [vmem:[%s2873_s16 + $0x240] sm:$0xff] %v2032_v35  ;;  %v1398_v59 = vadd.f32 1.0, %v2417_v12  ;;  %v1401_v0 = vmul.f32 -0.5, %v2417_v12  ;;  %vm4061_vm9 = vcmp.lt.f32.partialorder %v1377_v4, 0.0004427343  ;;  %v1393_v47 = vadd.f32 1.0, %v1392_v42 }
 0x170   : > { %v4050_v40 = vpop.eup %2418  ;;  %v1404_v44 = vand.u32 2147483647, %v2417_v12  ;;  %v1376_v7 = vmul.f32 %v4001_v51, %v1375_v18  ;;  %v1385_v24 = vmul.f32 %v4009_v43, %v1384_v23  ;;  %v686_v5 = vmul.f32 1.442695, %v508_v32  ;;  %v4096_v58 = vld [vmem:[%s2708_s29 + $0x2a8] sm:$0xff] }
 0x171   : > { %v4055_v46 = vpop.eup %2420  ;;  %2432 = vlog2.f32 %v1398_v59  ;;  %v1407_v16 = vadd.f32 1.0, %v4050_v40  ;;  %vm4068_vm10 = vcmp.lt.f32.partialorder %v1386_v60, 0.0004427343  ;;  %vm4072_vm11 = vcmp.lt.f32.partialorder %v1395_v50, 0.0004427343  ;;  %v4105_v50 = vld [vmem:[%s2708_s29 + $0x2b0] sm:$0xff] }
 0x172   : > { %v1416_v22 = vadd.f32 1.0, %v4055_v46  ;;  %v414_v37 = vand.u32 2147483647, %v4059_v26  ;;  %v1402_v51 = vadd.f32 1.0, %v1401_v0  ;;  %v688_v43 = vmul.f32 1.442695, %v509_v56 }
 0x173   : > { %2434 = vlog2.f32 %v1407_v16  ;;  %v2423_v31 = vpop.eup %2422  ;;  %v1394_v14 = vmul.f32 %v4021_v2, %v1393_v47  ;;  %vm4080_vm12 = vcmp.lt.f32.partialorder %v1404_v44, 0.0004427343  ;;  %v1410_v3 = vmul.f32 -0.5, %v4050_v40 }
 0x174   : > { %2436 = vlog2.f32 %v1416_v22  ;;  %v4077_v57 = vpop.eup %2424  ;;  %v1373_v27 = vmul.f32 0.6931472, %v2423_v31  ;;  %v1419_v15 = vmul.f32 -0.5, %v4055_v46  ;;  %v1413_v2 = vand.u32 2147483647, %v4050_v40 }
 0x175   : > { %2438 = vpow2.f32 %v684_v28  ;;  %v2427_v54 = vpop.eup %2426  ;;  %v1425_v55 = vadd.f32 1.0, %v4077_v57  ;;  %v510_v20 = vsub.f32 0.0, %v414_v37  ;;  %v1403_v4 = vmul.f32 %v2417_v12, %v1402_v51 }
 0x176   : > { %v1379_v13 = vsel %vm4061_vm9, %v1376_v7, %v1373_v27  ;;  %v1382_v1 = vmul.f32 0.6931472, %v2427_v54  ;;  %2440 = vpow2.f32 %v686_v5  ;;  %v1428_v42 = vmul.f32 -0.5, %v4077_v57 }
 0x177   : > { %v1651_v17 = vadd.f32 %v1379_v13, %v307_v62  ;;  %2442 = vlog2.f32 %v1425_v55  ;;  %v1422_v23 = vand.u32 2147483647, %v4055_v46  ;;  %v1411_v59 = vadd.f32 1.0, %v1410_v3 }
 0x178   : > { %v2429_v35 = vpop.eup %2428  ;;  %v1388_v34 = vsel %vm4068_vm10, %v1385_v24, %v1382_v1  ;;  %2444 = vpow2.f32 %v688_v43  ;;  %v1420_v32 = vadd.f32 1.0, %v1419_v15  ;;  %v690_v12 = vmul.f32 1.442695, %v510_v20  ;;  %v4125_v24 = vld [vmem:[%s2708_s29 + $0x2b8] sm:$0xff]  ;;  %v4144_v15 = vld [vmem:[%s2708_s29 + $0x2c0] sm:$0xff] }
 0x179   : > { %v4098_v30 = vpop.eup %2430  ;;  %v2033_v33 = vadd.f32 -0.6931472, %v1651_v17  ;;  %v1652_v62 = vadd.f32 %v1388_v34, %v308_v49  ;;  %v1391_v18 = vmul.f32 0.6931472, %v2429_v35  ;;  %v1431_v41 = vand.u32 2147483647, %v4077_v57 }
 0x17a   : > { %v1434_v60 = vadd.f32 1.0, %v4098_v30  ;;  %v415_v49 = vand.u32 2147483647, %v4096_v58  ;;  %vm4114_vm13 = vcmp.lt.f32.partialorder %v1413_v2, 0.0004427343  ;;  %v1429_v10 = vadd.f32 1.0, %v1428_v42 }
 0x17b   : > { %1843 = vst [vmem:[%s2873_s16 + $0x248] sm:$0xff] %v2033_v33  ;;  %v2034_v0 = vadd.f32 -0.6931472, %v1652_v62  ;;  %v1397_v16 = vsel %vm4072_vm11, %v1394_v14, %v1391_v18  ;;  %vm4119_vm14 = vcmp.lt.f32.partialorder %v1422_v23, 0.0004427343  ;;  %v1412_v5 = vmul.f32 %v4050_v40, %v1411_v59 }
 0x17c   : > { %v1653_v28 = vadd.f32 %v1397_v16, %v309_v29  ;;  %2446 = vlog2.f32 %v1434_v60  ;;  %v511_v22 = vsub.f32 0.0, %v415_v49  ;;  %v416_v7 = vand.u32 2147483647, %v4105_v50  ;;  %v4175_v16 = vld [vmem:[%s2708_s29 + $0x2c8] sm:$0xff] }
 0x17d   : > { %1844 = vst [vmem:[%s2873_s16 + $0x250] sm:$0xff] %v2034_v0  ;;  %2448 = vpow2.f32 %v690_v12  ;;  %v1437_v31 = vmul.f32 -0.5, %v4098_v30  ;;  %v1421_v48 = vmul.f32 %v4055_v46, %v1420_v32  ;;  %vm4130_vm15 = vcmp.lt.f32.partialorder %v1431_v41, 0.0004427343 }
 0x17e   : > { %v2433_v47 = vpop.eup %2432  ;;  %v2035_v39 = vadd.f32 -0.6931472, %v1653_v28  ;;  %v692_v27 = vmul.f32 1.442695, %v511_v22  ;;  %v512_v51 = vsub.f32 0.0, %v416_v7  ;;  %v1430_v40 = vmul.f32 %v4077_v57, %v1429_v10 }
 0x17f   : > { %v1400_v29 = vmul.f32 0.6931472, %v2433_v47  ;;  %v417_v3 = vand.u32 2147483647, %v4125_v24  ;;  %v1438_v17 = vadd.f32 1.0, %v1437_v31  ;;  %v315_v0 = vmax.f32 %v4025_v25, 0.0 }
 0x180   : > { %v2435_v11 = vpop.eup %2434  ;;  %1845 = vst [vmem:[%s2873_s16 + $0x258] sm:$0xff] %v2035_v39  ;;  %2450 = vpow2.f32 %v692_v27  ;;  %v694_v1 = vmul.f32 1.442695, %v512_v51  ;;  %v1440_v2 = vand.u32 2147483647, %v4098_v30  ;;  %v317_v22 = vmax.f32 %v4039_v63, 0.0 }
 0x181   : > { %v2437_v43 = vpop.eup %2436  ;;  %v1406_v54 = vsel %vm4080_vm12, %v1403_v4, %v1400_v29  ;;  %v1409_v14 = vmul.f32 0.6931472, %v2435_v11  ;;  %v513_v42 = vsub.f32 0.0, %v417_v3  ;;  %v418_v33 = vand.u32 2147483647, %v4144_v15  ;;  %v4190_v29 = vld [vmem:[%s2708_s29 + $0x2d0] sm:$0xff] }
 0x182   : > { %v4139_v55 = vpop.eup %2438  ;;  %v1654_v46 = vadd.f32 %v1406_v54, %v310_v61  ;;  %v1418_v13 = vmul.f32 0.6931472, %v2437_v43  ;;  %2452 = vpow2.f32 %v694_v1  ;;  %v1439_v12 = vmul.f32 %v4098_v30, %v1438_v17 }
 0x183   : > { %v1415_v38 = vsel %vm4114_vm13, %v1412_v5, %v1409_v14  ;;  %v1443_v57 = vadd.f32 1.0, %v4139_v55  ;;  %v4150_v20 = vpop.eup %2440  ;;  %v1446_v18 = vmul.f32 -0.5, %v4139_v55  ;;  %vm4177_vm0 = vcmp.lt.f32.partialorder %v1440_v2, 0.0004427343 }
 0x184   : > { %v2036_v35 = vadd.f32 -0.6931472, %v1654_v46  ;;  %v1655_v52 = vadd.f32 %v1415_v38, %v311_v19  ;;  %v1424_v61 = vsel %vm4119_vm14, %v1421_v48, %v1418_v13  ;;  %v2443_v34 = vpop.eup %2442  ;;  %v1452_v23 = vadd.f32 1.0, %v4150_v20 }
 0x185   : > { %v1656_v4 = vadd.f32 %v1424_v61, %v312_v45  ;;  %2454 = vlog2.f32 %v1443_v57  ;;  %v4159_v62 = vpop.eup %2444  ;;  %v1427_v19 = vmul.f32 0.6931472, %v2443_v34  ;;  %v314_v45 = vmax.f32 %v3995_v6, 0.0  ;;  %v4215_v34 = vld [vmem:[%s2708_s29 + $0x2d8] sm:$0xff] }
 0x186   : > { %1846 = vst [vmem:[%s2873_s16 + $0x260] sm:$0xff] %v2036_v35  ;;  %v2037_v8 = vadd.f32 -0.6931472, %v1655_v52  ;;  %v1461_v32 = vadd.f32 1.0, %v4159_v62  ;;  %2456 = vlog2.f32 %v1452_v23  ;;  %v1447_v6 = vadd.f32 1.0, %v1446_v18  ;;  %v4227_v23 = vld [vmem:[%s2708_s29 + $0x2e0] sm:$0xff] }
 0x187   : > { %v2038_v59 = vadd.f32 -0.6931472, %v1656_v4  ;;  %v1433_v9 = vsel %vm4130_vm15, %v1430_v40, %v1427_v19  ;;  %v696_v28 = vmul.f32 1.442695, %v513_v42  ;;  %v514_v56 = vsub.f32 0.0, %v418_v33 }
 0x188   : > { %1847 = vst [vmem:[%s2873_s16 + $0x268] sm:$0xff] %v2037_v8  ;;  %v1657_v60 = vadd.f32 %v1433_v9, %v313_v21  ;;  %2458 = vlog2.f32 %v1461_v32  ;;  %v316_v30 = vmax.f32 %v4034_v36, 0.0  ;;  %v1455_v47 = vmul.f32 -0.5, %v4150_v20  ;;  %v4261_v36 = vld [vmem:[%s2708_s29 + $0x2f0] sm:$0xff]  ;;  %v4297_v9 = vld [vmem:[%s2708_s29 + $0x2f8] sm:$0xff] }
 0x189   : > { %1848 = vst [vmem:[%s2873_s16 + $0x270] sm:$0xff] %v2038_v59  ;;  %v2447_v41 = vpop.eup %2446  ;;  %v1449_v44 = vand.u32 2147483647, %v4139_v55  ;;  %v1464_v7 = vmul.f32 -0.5, %v4159_v62  ;;  %2460 = vpow2.f32 %v696_v28  ;;  %v698_v31 = vmul.f32 1.442695, %v514_v56 }
 0x18a   : > { %v4181_v10 = vpop.eup %2448  ;;  %v2039_v53 = vadd.f32 -0.6931472, %v1657_v60  ;;  %v1436_v21 = vmul.f32 0.6931472, %v2447_v41  ;;  %v419_v11 = vand.u32 2147483647, %v4175_v16  ;;  %v1448_v37 = vmul.f32 %v4139_v55, %v1447_v6 }
 0x18b   : > { %v1470_v39 = vadd.f32 1.0, %v4181_v10  ;;  %v1458_v27 = vand.u32 2147483647, %v4150_v20  ;;  %v1456_v43 = vadd.f32 1.0, %v1455_v47  ;;  %v420_v14 = vand.u32 2147483647, %v4190_v29 }
 0x18c   : > { %1849 = vst [vmem:[%s2873_s16 + $0x278] sm:$0xff] %v2039_v53  ;;  %v1442_v5 = vsel %vm4177_vm0, %v1439_v12, %v1436_v21  ;;  %v515_v54 = vsub.f32 0.0, %v419_v11  ;;  %v1467_v3 = vand.u32 2147483647, %v4159_v62  ;;  %v1473_v46 = vmul.f32 -0.5, %v4181_v10  ;;  %v4238_v60 = vld [vmem:[%s2708_s29 + $0x2e8] sm:$0xff] }
 0x18d   : > { %v1658_v48 = vadd.f32 %v1442_v5, %v314_v45  ;;  %2462 = vlog2.f32 %v1470_v39  ;;  %v4198_v51 = vpop.eup %2450  ;;  %v1465_v1 = vadd.f32 1.0, %v1464_v7  ;;  %v1476_v38 = vand.u32 2147483647, %v4181_v10 }
 0x18e   : > { %2464 = vpow2.f32 %v698_v31  ;;  %v1479_v13 = vadd.f32 1.0, %v4198_v51  ;;  %v700_v17 = vmul.f32 1.442695, %v515_v54  ;;  %v516_v2 = vsub.f32 0.0, %v420_v14 }
 0x18f   : > { %v2040_v40 = vadd.f32 -0.6931472, %v1658_v48  ;;  %v4204_v55 = vpop.eup %2452  ;;  %vm4208_vm1 = vcmp.lt.f32.partialorder %v1449_v44, 0.0004427343  ;;  %v318_v52 = vmax.f32 %v4059_v26, 0.0  ;;  %v1457_v42 = vmul.f32 %v4150_v20, %v1456_v43 }
 0x190   : > { %2466 = vlog2.f32 %v1479_v13  ;;  %v1488_v61 = vadd.f32 1.0, %v4204_v55  ;;  %vm4218_vm2 = vcmp.lt.f32.partialorder %v1458_v27, 0.0004427343  ;;  %vm4222_vm3 = vcmp.lt.f32.partialorder %v1467_v3, 0.0004427343 }
 0x191   : > { %1850 = vst [vmem:[%s2873_s16 + $0x280] sm:$0xff] %v2040_v40  ;;  %2468 = vpow2.f32 %v700_v17  ;;  %v1474_v19 = vadd.f32 1.0, %v1473_v46  ;;  %v702_v18 = vmul.f32 1.442695, %v516_v2  ;;  %v1466_v20 = vmul.f32 %v4159_v62, %v1465_v1 }
 0x192   : > { %v2455_v57 = vpop.eup %2454  ;;  %2470 = vlog2.f32 %v1488_v61  ;;  %vm4232_vm4 = vcmp.lt.f32.partialorder %v1476_v38, 0.0004427343  ;;  %v421_v45 = vand.u32 2147483647, %v4215_v34  ;;  %v1482_v6 = vmul.f32 -0.5, %v4198_v51 }
 0x193   : > { %v1445_v4 = vmul.f32 0.6931472, %v2455_v57  ;;  %v2457_v59 = vpop.eup %2456  ;;  %2472 = vpow2.f32 %v702_v18  ;;  %v1491_v62 = vmul.f32 -0.5, %v4204_v55  ;;  %v422_v53 = vand.u32 2147483647, %v4227_v23 }
 0x194   : > { %v1454_v49 = vmul.f32 0.6931472, %v2457_v59  ;;  %v517_v56 = vsub.f32 0.0, %v421_v45  ;;  %v1475_v44 = vmul.f32 %v4181_v10, %v1474_v19  ;;  %v423_v25 = vand.u32 2147483647, %v4238_v60 }
 0x195   : > { %v1451_v32 = vsel %vm4208_vm1, %v1448_v37, %v1445_v4  ;;  %v2459_v12 = vpop.eup %2458  ;;  %v518_v5 = vsub.f32 0.0, %v422_v53  ;;  %v1483_v48 = vadd.f32 1.0, %v1482_v6  ;;  %v1485_v10 = vand.u32 2147483647, %v4198_v51 }
 0x196   : > { %v1659_v41 = vadd.f32 %v1451_v32, %v315_v0  ;;  %v1463_v28 = vmul.f32 0.6931472, %v2459_v12  ;;  %v1460_v47 = vsel %vm4218_vm2, %v1457_v42, %v1454_v49  ;;  %v704_v39 = vmul.f32 1.442695, %v517_v56  ;;  %v4253_v31 = vpop.eup %2460 }
 0x197   : > { %v1660_v0 = vadd.f32 %v1460_v47, %v316_v30  ;;  %v1494_v37 = vand.u32 2147483647, %v4204_v55  ;;  %v1492_v43 = vadd.f32 1.0, %v1491_v62  ;;  %v1497_v54 = vadd.f32 1.0, %v4253_v31 }
 0x198   : > { %v2041_v21 = vadd.f32 -0.6931472, %v1659_v41  ;;  %v1469_v7 = vsel %vm4222_vm3, %v1466_v20, %v1463_v28  ;;  %v519_v14 = vsub.f32 0.0, %v423_v25  ;;  %2474 = vpow2.f32 %v704_v39 }
 0x199   : > { %v1661_v11 = vadd.f32 %v1469_v7, %v317_v22  ;;  %v2042_v27 = vadd.f32 -0.6931472, %v1660_v0  ;;  %v706_v22 = vmul.f32 1.442695, %v518_v5  ;;  %2476 = vlog2.f32 %v1497_v54 }
 0x19a   : > { %1851 = vst [vmem:[%s2873_s16 + $0x288] sm:$0xff] %v2041_v21  ;;  %v2463_v30 = vpop.eup %2462  ;;  %v424_v13 = vand.u32 2147483647, %v4261_v36  ;;  %v319_v38 = vmax.f32 %v4096_v58, 0.0  ;;  %v1484_v17 = vmul.f32 %v4198_v51, %v1483_v48  ;;  %vm4276_vm5 = vcmp.lt.f32.partialorder %v1485_v10, 0.0004427343 }
 0x19b   : > { %v4264_v40 = vpop.eup %2464  ;;  %v2043_v3 = vadd.f32 -0.6931472, %v1661_v11  ;;  %v1472_v63 = vmul.f32 0.6931472, %v2463_v30  ;;  %1852 = vst [vmem:[%s2873_s16 + $0x290] sm:$0xff] %v2042_v27  ;;  %2478 = vpow2.f32 %v706_v22  ;;  %v320_v33 = vmax.f32 %v4105_v50, 0.0 }
 0x19c   : > { %v1506_v46 = vadd.f32 1.0, %v4264_v40  ;;  %v708_v61 = vmul.f32 1.442695, %v519_v14  ;;  %v1493_v58 = vmul.f32 %v4204_v55, %v1492_v43  ;;  %vm4284_vm6 = vcmp.lt.f32.partialorder %v1494_v37, 0.0004427343 }
 0x19d   : > { %1853 = vst [vmem:[%s2873_s16 + $0x298] sm:$0xff] %v2043_v3  ;;  %v1478_v1 = vsel %vm4232_vm4, %v1475_v44, %v1472_v63  ;;  %v2467_v2 = vpop.eup %2466  ;;  %v1500_v8 = vmul.f32 -0.5, %v4253_v31  ;;  %v520_v18 = vsub.f32 0.0, %v424_v13  ;;  %v1509_v20 = vmul.f32 -0.5, %v4264_v40 }
 0x19e   : > { %v1662_v57 = vadd.f32 %v1478_v1, %v318_v52  ;;  %2480 = vlog2.f32 %v1506_v46  ;;  %v4280_v4 = vpop.eup %2468  ;;  %v1481_v42 = vmul.f32 0.6931472, %v2467_v2  ;;  %v1503_v62 = vand.u32 2147483647, %v4253_v31 }
 0x19f   : > { %v2471_v26 = vpop.eup %2470  ;;  %v1515_v19 = vadd.f32 1.0, %v4280_v4  ;;  %2482 = vpow2.f32 %v708_v61  ;;  %v1501_v6 = vadd.f32 1.0, %v1500_v8  ;;  %v710_v28 = vmul.f32 1.442695, %v520_v18 }
 0x1a0   : > { %v2044_v52 = vadd.f32 -0.6931472, %v1662_v57  ;;  %v1487_v59 = vsel %vm4276_vm5, %v1484_v17, %v1481_v42  ;;  %v1490_v32 = vmul.f32 0.6931472, %v2471_v26  ;;  %v4292_v50 = vpop.eup %2472  ;;  %v425_v56 = vand.u32 2147483647, %v4297_v9 }
 0x1a1   : > { %v1663_v55 = vadd.f32 %v1487_v59, %v319_v38  ;;  %2484 = vlog2.f32 %v1515_v19  ;;  %v1524_v12 = vadd.f32 1.0, %v4292_v50  ;;  %v1510_v21 = vadd.f32 1.0, %v1509_v20 }
 0x1a2   : > { %1854 = vst [vmem:[%s2873_s16 + $0x2a0] sm:$0xff] %v2044_v52  ;;  %v1496_v45 = vsel %vm4284_vm6, %v1493_v58, %v1490_v32  ;;  %v1518_v47 = vmul.f32 -0.5, %v4280_v4  ;;  %v1512_v44 = vand.u32 2147483647, %v4264_v40  ;;  %v521_v25 = vsub.f32 0.0, %v425_v56 }
 0x1a3   : > { %v2045_v41 = vadd.f32 -0.6931472, %v1663_v55  ;;  %v1664_v49 = vadd.f32 %v1496_v45, %v320_v33  ;;  %2486 = vlog2.f32 %v1524_v12  ;;  %v321_v7 = vmax.f32 %v4125_v24, 0.0 }
 0x1a4   : > { %2488 = vpow2.f32 %v710_v28  ;;  %v1502_v39 = vmul.f32 %v4253_v31, %v1501_v6  ;;  %vm4312_vm7 = vcmp.lt.f32.partialorder %v1503_v62, 0.0004427343  ;;  %v1521_v48 = vand.u32 2147483647, %v4280_v4 }
 0x1a5   : > { %1855 = vst [vmem:[%s2873_s16 + $0x2a8] sm:$0xff] %v2045_v41  ;;  %v2046_v53 = vadd.f32 -0.6931472, %v1664_v49  ;;  %v4307_v0 = vpop.eup %2474  ;;  %v1527_v10 = vmul.f32 -0.5, %v4292_v50  ;;  %v1511_v43 = vmul.f32 %v4264_v40, %v1510_v21  ;;  %v1519_v54 = vadd.f32 1.0, %v1518_v47 }
 0x1a6   : > { %v2477_v5 = vpop.eup %2476  ;;  %v1533_v37 = vadd.f32 1.0, %v4307_v0  ;;  %v712_v24 = vmul.f32 1.442695, %v521_v25  ;;  %v322_v31 = vmax.f32 %v4144_v15, 0.0  ;;  %vm4323_vm8 = vcmp.lt.f32.partialorder %v1512_v44, 0.0004427343 }
 0x1a7   : > { %1856 = vst [vmem:[%s2873_s16 + $0x2b0] sm:$0xff] %v2046_v53  ;;  %v1499_v27 = vmul.f32 0.6931472, %v2477_v5  ;;  %v323_v13 = vmax.f32 %v4175_v16, 0.0  ;;  %vm4331_vm9 = vcmp.lt.f32.partialorder %v1521_v48, 0.0004427343  ;;  %v1520_v2 = vmul.f32 %v4280_v4, %v1519_v54 }
 0x1a8   : > { %v4319_v30 = vpop.eup %2478  ;;  %2490 = vlog2.f32 %v1533_v37  ;;  %v1528_v15 = vadd.f32 1.0, %v1527_v10  ;;  %v1530_v57 = vand.u32 2147483647, %v4292_v50  ;;  %v1536_v42 = vmul.f32 -0.5, %v4307_v0 }
 0x1a9   : > { %v1542_v63 = vadd.f32 1.0, %v4319_v30  ;;  %v1505_v22 = vsel %vm4312_vm7, %v1502_v39, %v1499_v27  ;;  %v1545_v52 = vmul.f32 -0.5, %v4319_v30  ;;  %v324_v19 = vmax.f32 %v4190_v29, 0.0 }
 0x1aa   : > { %v1665_v40 = vadd.f32 %v1505_v22, %v321_v7  ;;  %v1529_v26 = vmul.f32 %v4292_v50, %v1528_v15  ;;  %vm1531_vm10 = vcmp.lt.f32.partialorder %v1530_v57, 0.0004427343  ;;  %v1537_v55 = vadd.f32 1.0, %v1536_v42 }
 0x1ab   : > { %v2481_v14 = vpop.eup %2480  ;;  %2492 = vlog2.f32 %v1542_v63  ;;  %v1539_v20 = vand.u32 2147483647, %v4307_v0  ;;  %v1546_v41 = vadd.f32 1.0, %v1545_v52  ;;  %v1548_v28 = vand.u32 2147483647, %v4319_v30 }
 0x1ac   : > { %v1508_v46 = vmul.f32 0.6931472, %v2481_v14  ;;  %v2483_v38 = vpop.eup %2482  ;;  %2494 = vpow2.f32 %v712_v24  ;;  %v2047_v16 = vadd.f32 -0.6931472, %v1665_v40  ;;  %v1538_v29 = vmul.f32 %v4307_v0, %v1537_v55 }
 0x1ad   : > { %v1551_v33 = vadd.f32 1.0, %v2483_v38  ;;  %v1554_v49 = vmul.f32 -0.5, %v2483_v38  ;;  %v325_v53 = vmax.f32 %v4215_v34, 0.0  ;;  %vm1540_vm11 = vcmp.lt.f32.partialorder %v1539_v20, 0.0004427343 }
 0x1ae   : > { %v1514_v17 = vsel %vm4323_vm8, %v1511_v43, %v1508_v46  ;;  %v2485_v35 = vpop.eup %2484  ;;  %1857 = vst [vmem:[%s2873_s16 + $0x2b8] sm:$0xff] %v2047_v16  ;;  %v1547_v47 = vmul.f32 %v4319_v30, %v1546_v41  ;;  %v1557_v25 = vand.u32 2147483647, %v2483_v38  ;;  %v326_v39 = vmax.f32 %v4227_v23, 0.0 }
 0x1af   : > { %v1666_v61 = vadd.f32 %v1514_v17, %v322_v31  ;;  %v1517_v58 = vmul.f32 0.6931472, %v2485_v35  ;;  %2496 = vlog2.f32 %v1551_v33  ;;  %v1555_v44 = vadd.f32 1.0, %v1554_v49 }
 0x1b0   : > { %v2487_v8 = vpop.eup %2486  ;;  %vm1549_vm12 = vcmp.lt.f32.partialorder %v1548_v28, 0.0004427343  ;;  %v327_v27 = vmax.f32 %v4238_v60, 0.0  ;;  %vm1558_vm13 = vcmp.lt.f32.partialorder %v1557_v25, 0.0004427343  ;;  %v328_v60 = vmax.f32 %v4261_v36, 0.0 }
 0x1b1   : > { %v2048_v51 = vadd.f32 -0.6931472, %v1666_v61  ;;  %v1523_v4 = vsel %vm4331_vm9, %v1520_v2, %v1517_v58  ;;  %v2489_v18 = vpop.eup %2488  ;;  %v1526_v32 = vmul.f32 0.6931472, %v2487_v8  ;;  %v1556_v43 = vmul.f32 %v2483_v38, %v1555_v44 }
 0x1b2   : > { %v1667_v59 = vadd.f32 %v1523_v4, %v323_v13  ;;  %v1560_v45 = vadd.f32 1.0, %v2489_v18  ;;  %v1563_v5 = vmul.f32 -0.5, %v2489_v18  ;;  %v1566_v31 = vand.u32 2147483647, %v2489_v18 }
 0x1b3   : > { %1858 = vst [vmem:[%s2873_s16 + $0x2c0] sm:$0xff] %v2048_v51  ;;  %v1532_v12 = vsel %vm1531_vm10, %v1529_v26, %v1526_v32  ;;  %v329_v42 = vmax.f32 %v4297_v9, 0.0 }
 0x1b4   : > { %v2049_v50 = vadd.f32 -0.6931472, %v1667_v59  ;;  %v1668_v6 = vadd.f32 %v1532_v12, %v324_v19  ;;  %2498 = vlog2.f32 %v1560_v45  ;;  %v1564_v14 = vadd.f32 1.0, %v1563_v5 }
 0x1b5   : > { %v2491_v62 = vpop.eup %2490  ;;  %vm1567_vm14 = vcmp.lt.f32.partialorder %v1566_v31, 0.0004427343 }
 0x1b6   : > { %1859 = vst [vmem:[%s2873_s16 + $0x2c8] sm:$0xff] %v2049_v50  ;;  %v2050_v56 = vadd.f32 -0.6931472, %v1668_v6  ;;  %v1535_v21 = vmul.f32 0.6931472, %v2491_v62  ;;  %v1565_v46 = vmul.f32 %v2489_v18, %v1564_v14 }
 0x1b8   : > { %v2493_v7 = vpop.eup %2492  ;;  %1860 = vst [vmem:[%s2873_s16 + $0x2d0] sm:$0xff] %v2050_v56  ;;  %v1541_v48 = vsel %vm1540_vm11, %v1538_v29, %v1535_v21 }
 0x1b9   : > { %v2495_v11 = vpop.eup %2494  ;;  %v1544_v0 = vmul.f32 0.6931472, %v2493_v7  ;;  %v1669_v10 = vadd.f32 %v1541_v48, %v325_v53 }
 0x1ba   : > { %v1569_v37 = vadd.f32 1.0, %v2495_v11  ;;  %v1572_v13 = vmul.f32 -0.5, %v2495_v11  ;;  %v1575_v57 = vand.u32 2147483647, %v2495_v11 }
 0x1bb   : > { %v1550_v34 = vsel %vm1549_vm12, %v1547_v47, %v1544_v0  ;;  %v2051_v54 = vadd.f32 -0.6931472, %v1669_v10 }
 0x1bc   : > { %v2497_v30 = vpop.eup %2496  ;;  %v1670_v24 = vadd.f32 %v1550_v34, %v326_v39  ;;  %2500 = vlog2.f32 %v1569_v37  ;;  %v1573_v17 = vadd.f32 1.0, %v1572_v13  ;;  %vm1576_vm15 = vcmp.lt.f32.partialorder %v1575_v57, 0.0004427343 }
 0x1bd   : > { %v1553_v23 = vmul.f32 0.6931472, %v2497_v30  ;;  %1861 = vst [vmem:[%s2873_s16 + $0x2d8] sm:$0xff] %v2051_v54 }
 0x1be   : > { %v2052_v3 = vadd.f32 -0.6931472, %v1670_v24  ;;  %v1574_v16 = vmul.f32 %v2495_v11, %v1573_v17 }
 0x1bf   : > { %v1559_v63 = vsel %vm1558_vm13, %v1556_v43, %v1553_v23 }
 0x1c0   : > { %1862 = vst [vmem:[%s2873_s16 + $0x2e0] sm:$0xff] %v2052_v3  ;;  %v1671_v22 = vadd.f32 %v1559_v63, %v327_v27 }
 0x1c1   : > { %v2499_v40 = vpop.eup %2498 }
 0x1c2   : > { %v2053_v1 = vadd.f32 -0.6931472, %v1671_v22  ;;  %v1562_v15 = vmul.f32 0.6931472, %v2499_v40 }
 0x1c4   : > { %1863 = vst [vmem:[%s2873_s16 + $0x2e8] sm:$0xff] %v2053_v1  ;;  %v1568_v38 = vsel %vm1567_vm14, %v1565_v46, %v1562_v15 }
 0x1c5   : > { %v1672_v2 = vadd.f32 %v1568_v38, %v328_v60 }
 0x1c7   : > { %v2054_v35 = vadd.f32 -0.6931472, %v1672_v2 }
 0x1c9   : > { %v2501_v61 = vpop.eup %2500  ;;  %1864 = vst [vmem:[%s2873_s16 + $0x2f0] sm:$0xff] %v2054_v35 }
 0x1ca   : > { %v1571_v36 = vmul.f32 0.6931472, %v2501_v61 }
 0x1cc   : > { %v1577_v33 = vsel %vm1576_vm15, %v1574_v16, %v1571_v36 }
 0x1cd   : > { %v1673_v58 = vadd.f32 %v1577_v33, %v329_v42 }
 0x1cf   : > { %v2055_v51 = vadd.f32 -0.6931472, %v1673_v58 }
 0x1d1   : > { %1865 = vst [vmem:[%s2873_s16 + $0x2f8] sm:$0xff] %v2055_v51 }
 0x1d2   : > { %2543 = shalt.err (!%p2540_p9)
}
 0x1d3   : > { %s2544_s11 = scalar_lea.hbm %s4367_s30, 12288  ;;  %s2548_s19 = scalar_lea.hbm %s4413_s1, 49152 }
 0x1d4   : > { %p2545_p13 = scmp.ne.s32.totalorder %s4367_s30, %s2544_s11  ;;  %p2549_p2 = scmp.lt.s32.totalorder %s4367_s30, %s4413_s1 }
 0x1d5   : > { %p2550_p3 = scmp.lt.s32.totalorder %s2548_s19, %s2544_s11 }
 0x1d6   : > { %p2546_p1 = pnand %p2545_p13, %p4606_p11 }
 0x1d7   : > { %p2551_p6 = por %p2550_p3, %p2549_p2 }
 0x1d8   : > { %p2547_p0 = pneg %p2546_p1 }
 0x1da   : > { %p2552_p10 = pnand %p2551_p6, %p2547_p0 }
 0x1dc   : > { %2555 = shalt.err (!%p2552_p10)
}
 0x1dd   : > { %s2600_s23 = smov 512   ;;  %s2601_s26 = smov 32  }
 0x1de   : > { %2070 = dma.vmem_to_hbm [thread:$0]  (%p4606_p11), %s4369_s25, 12288, %s4367_s30, %s1867_s2, %s2600_s23, %s2600_s23, %s2601_s26  }
 0x1df PF: > { %p2081_p12 = scmp.ge.s32.totalorder %s2594_s9, 2  ;;  %s1896_s29 = sand.u32 1, %s2582_s6  }
 0x1e0   : > { %p4607_p4 = scmp.ne.s32.totalorder %s4418_s18, 0  ;;  %s1897_s16 = scalar_lea.sflag [#allocation4], %s1896_s29 }
 0x1e2   : > { %p2077_p5 = pnand %p2081_p12, %p4607_p4 }
 0x1e4   : > { %p2078_p7 = pneg %p2077_p5 }
 0x1e6   : > { %2577 = dma.done.wait (%p2078_p7), %s1897_s16, 12288  }
 0x1e7   : > { %2579 = vsyncadd (%p2078_p7), %s1897_s16, 4294955008  ;;  %p14_p8 = scmp.ge.s32.totalorder %s2637_s12, 6   ;;  %s4608_s6 = smov %s2586_s7 }
 0x1e8   : > { %s4609_s7 = smov %s2590_s8  ;;  %s4610_s8 = smov %s2649_s15 }
 0x1e9   : > { %s4611_s9 = smov %s2637_s12  ;;  %16 = sbr.rel (!%p14_p8) target bundleno = 5 (0x5), region = 69 }
 0x1ee   :  { %1902 = vsyncpa [#allocation3], 1 }
 0x1ef   :  { %1904 = vsyncpa [#allocation3 + $0x1], 1 }
 0x1f0   :  { %1905 = vsyncpa [#allocation4], 1 }
 0x1f1   :  { %1907 = vsyncpa [#allocation4 + $0x1], 1 }

</bundles_post_ra>
